<compile_context>
chip_gen: v6e
topology: v6e:2x2x1
jax: 0.10.0
libtpu: 0.0.40
codegen_flags: <defaults>
</compile_context>

<pallas_src>
import math

import jax
import jax.numpy as jnp
from jax.experimental import pallas as pl
from jax.experimental.pallas import tpu as pltpu


PARAM_ORDER = ['wq1', 'bq1', 'wk1', 'bk1', 'wv1', 'bv1', 'wo1', 'bo1',
               'wq2', 'bq2', 'wk2', 'bk2', 'wv2', 'bv2', 'wo2', 'bo2',
               'wf1', 'bf1', 'wf2', 'bf2',
               'g1', 'be1', 'g2', 'be2', 'g3', 'be3']
_NUM_PARAMS = len(PARAM_ORDER)


def _vmem_capacity_bytes():
    try:
        return int(pltpu.get_tpu_info().vmem_capacity_bytes)
    except Exception:
        return 64 << 20          # conservative fallback (v7x per-TC VMEM)


def _bf16_eup_ok():
    """bf16 exp only pays off on chips with a bf16 VPU/EUP (v6e, v7x, ...)."""
    try:
        kind = jax.devices()[0].device_kind.lower()
    except Exception:
        return False
    return any(g in kind for g in ('v6', 'v7', 'v8'))


def _estimate_vmem_bytes(tq, T, S, D, H, F, in_itemsize, attn_itemsize,
                         param_bytes, emit_attn):
    """Rough per-step VMEM footprint for a given query tile."""
    # double-buffered x / enc blocks + double-buffered weight blocks
    total = 2 * (T + S) * D * in_itemsize + 2 * param_bytes
    # persistent bf16 K/V scratch (self-attn + cross-attn)
    total += 2 * 2 * (T + S) * D
    # double-buffered output blocks
    total += 2 * tq * D * 4
    if emit_attn:
        total += 2 * H * tq * (T + S) * attn_itemsize
    # in-kernel f32 intermediates: scores / p / a, Q / ctx / residuals, FFN hidden
    total += 3 * H * tq * max(T, S) * 4 + 8 * tq * D * 4 + 2 * tq * F * 4
    # one-shot f32 K/V projection temporaries at t == 0
    total += 2 * (T + S) * D * 4
    return total


def _make_kernel(num_heads, d_model, d_head, tq, eps, emit_attn, exp_dtype):
    H, D, dh = num_heads, d_model, d_head
    bf16, f32 = jnp.bfloat16, jnp.float32

    def layernorm(x, g, b):
        mu = jnp.mean(x, axis=-1, keepdims=True)
        xc = x - mu
        var = jnp.mean(xc * xc, axis=-1, keepdims=True)
        return xc * jax.lax.rsqrt(var + eps) * g + b

    def mha(q2d, k_sc, v_sc, wq, bq, wo, bo, attn_ref):
        # q2d: (Tq, D) f32 ; k_sc / v_sc: (H, Tk, dh) bf16 cached in scratch
        # wq / wo: (D, D) bf16 ; bq / bo: (1, D) f32.  1/sqrt(dh) folded in wq/bq.
        Tq = q2d.shape[0]
        Q = jnp.dot(q2d.astype(bf16), wq[...], preferred_element_type=f32) + bq[...]
        Qh = Q.reshape(Tq, H, dh).transpose(1, 0, 2).astype(bf16)   # (H, Tq, dh)
        K = k_sc[...]
        V = v_sc[...]

        # Scores for all heads in one batched matmul: (H, Tq, Tk) f32.
        s = jnp.einsum('hqd,hkd->hqk', Qh, K, preferred_element_type=f32)
        s = s - jnp.max(s, axis=-1, keepdims=True)
        p = jnp.exp(s.astype(exp_dtype))                      # bf16 EUP on v6e/v7x
        l = jnp.sum(p.astype(f32), axis=-1, keepdims=True)    # f32 accumulation
        # exact reciprocal when attention weights are returned, EUP approx otherwise
        inv = pl.reciprocal(l, approx=not emit_attn)
        a = p * inv.astype(exp_dtype)                          # (H, Tq, Tk)

        if attn_ref is not None:
            attn_ref[0] = a.astype(attn_ref.dtype)            # single full-block store

        # Context per head, then merge heads and do one dense output projection.
        ctx = jnp.einsum('hqk,hkd->hqd', a.astype(bf16), V,
                         preferred_element_type=f32)           # (H, Tq, dh) f32
        ctx2d = ctx.transpose(1, 0, 2).reshape(Tq, D)          # (Tq, D) f32
        return jnp.dot(ctx2d.astype(bf16), wo[...],
                       preferred_element_type=f32) + bo[...]

    def kernel(*refs):
        x_ref, enc_ref = refs[:2]
        (wq1, bq1, wk1, bk1, wv1, bv1, wo1, bo1,
         wq2, bq2, wk2, bk2, wv2, bv2, wo2, bo2,
         wf1, bf1, wf2, bf2,
         g1, be1, g2, be2, g3, be3) = refs[2:2 + _NUM_PARAMS]
        rest = refs[2 + _NUM_PARAMS:]
        if emit_attn:
            out_ref, attn1_ref, attn2_ref = rest[:3]
            k1_sc, v1_sc, k2_sc, v2_sc = rest[3:]
        else:
            out_ref = rest[0]
            attn1_ref = attn2_ref = None
            k1_sc, v1_sc, k2_sc, v2_sc = rest[1:]

        t = pl.program_id(1)

        # --- once per batch row: project + cache K/V (self-attn and cross-attn) ---
        @pl.when(t == 0)
        def _():
            def project_kv(src, wk, bk, wv, bv, k_sc, v_sc):
                L = src.shape[0]
                sb = src.astype(bf16)
                K = jnp.dot(sb, wk[...], preferred_element_type=f32) + bk[...]
                V = jnp.dot(sb, wv[...], preferred_element_type=f32) + bv[...]
                k_sc[...] = K.reshape(L, H, dh).transpose(1, 0, 2).astype(bf16)
                v_sc[...] = V.reshape(L, H, dh).transpose(1, 0, 2).astype(bf16)
            project_kv(x_ref[0], wk1, bk1, wv1, bv1, k1_sc, v1_sc)
            project_kv(enc_ref[0], wk2, bk2, wv2, bv2, k2_sc, v2_sc)

        # Query / residual rows: slice out of the already-resident x block.
        start = pl.multiple_of(t * tq, tq)
        xq = x_ref[0, pl.ds(start, tq), :].astype(f32)         # (tq, D)

        # --- block 1: masked multi-head self-attention + residual + LN ---
        # TODO(synk): look_ahead_mask not applied (None path only).
        m1 = mha(xq, k1_sc, v1_sc, wq1, bq1, wo1, bo1, attn1_ref)
        s1 = layernorm(xq + m1, g1[...], be1[...])

        # --- block 2: cross attention over encoder output + residual + LN ---
        # TODO(synk): padding_mask not applied (None path only).
        m2 = mha(s1, k2_sc, v2_sc, wq2, bq2, wo2, bo2, attn2_ref)
        s2 = layernorm(s1 + m2, g2[...], be2[...])

        # --- block 3: FFN (Linear -> ReLU -> Linear) + residual + LN (dropout = id) ---
        h1 = jnp.maximum(
            jnp.dot(s2.astype(bf16), wf1[...], preferred_element_type=f32) + bf1[...],
            0.0)
        ffn = jnp.dot(h1.astype(bf16), wf2[...], preferred_element_type=f32) + bf2[...]
        out_ref[0] = layernorm(s2 + ffn, g3[...], be3[...]).astype(out_ref.dtype)

    return kernel


def _prep_params(params, num_heads, d_model):
    """Cast matmul weights to bf16 and fold 1/sqrt(dh) into wq/bq (plain JAX,
    outside the kernel)."""
    H, D = num_heads, d_model
    dh = D // H
    scale = 1.0 / math.sqrt(dh)
    bf16, f32 = jnp.bfloat16, jnp.float32
    out = {}
    for blk in ('1', '2'):
        out['wq' + blk] = (params['wq' + blk] * scale).astype(bf16)
        out['bq' + blk] = (params['bq' + blk] * scale).reshape(1, D).astype(f32)
        for nm in ('wk', 'wv', 'wo'):
            out[nm + blk] = params[nm + blk].astype(bf16)
        for nm in ('bk', 'bv', 'bo'):
            out[nm + blk] = params[nm + blk].reshape(1, D).astype(f32)
    out['wf1'] = params['wf1'].astype(bf16)
    out['bf1'] = params['bf1'].reshape(1, -1).astype(f32)
    out['wf2'] = params['wf2'].astype(bf16)
    out['bf2'] = params['bf2'].reshape(1, -1).astype(f32)
    for i in ('1', '2', '3'):
        out['g' + i] = params['g' + i].reshape(1, D).astype(f32)
        out['be' + i] = params['be' + i].reshape(1, D).astype(f32)
    return out


def decoder_layer(x, encoder_output, params, num_heads, eps=1e-6,
                  return_attention=True, attn_dtype=jnp.bfloat16):
    B, T, D = x.shape
    _, S, _ = encoder_output.shape
    H = num_heads
    assert D % H == 0
    dh = D // H
    F = params['wf1'].shape[-1]

    prepared = _prep_params(params, H, D)
    param_arrays = [prepared[k] for k in PARAM_ORDER]
    param_bytes = sum(int(a.size) * a.dtype.itemsize for a in param_arrays)

    in_itemsize = jnp.dtype(x.dtype).itemsize
    attn_itemsize = jnp.dtype(attn_dtype).itemsize if return_attention else 0

    # --- derive query tile and VMEM limit from the device's real VMEM budget ---
    cap = _vmem_capacity_bytes()
    budget = int(0.75 * cap)

    def est(q):
        return _estimate_vmem_bytes(q, T, S, D, H, F, in_itemsize, attn_itemsize,
                                    param_bytes, return_attention)

    tq = T                                     # default: whole sequence per step
    if est(T) > budget:
        for cand in (512, 256, 128, 64, 32, 16, 8):
            if T % cand == 0 and cand < T and est(cand) <= budget:
                tq = cand
                break
        else:
            divs = [c for c in (8, 16, 32, 64, 128) if T % c == 0 and c < T]
            tq = divs[0] if divs else T
    n_t = T // tq

    vmem_limit = int(min(cap, max(est(tq) + (8 << 20), 32 << 20)))

    exp_dtype = jnp.bfloat16 if _bf16_eup_ok() else jnp.float32
    kernel = _make_kernel(H, D, dh, tq, eps, return_attention, exp_dtype)

    def full_spec(a):
        nd = a.ndim
        return pl.BlockSpec(a.shape, lambda b, t, _nd=nd: (0,) * _nd)

    in_specs = ([pl.BlockSpec((1, T, D), lambda b, t: (b, 0, 0)),   # x (K/V + queries)
                 pl.BlockSpec((1, S, D), lambda b, t: (b, 0, 0))]   # encoder output
                + [full_spec(a) for a in param_arrays])

    out_shapes = [jax.ShapeDtypeStruct((B, T, D), jnp.float32)]
    out_specs = [pl.BlockSpec((1, tq, D), lambda b, t: (b, t, 0))]
    if return_attention:
        out_shapes += [jax.ShapeDtypeStruct((B, H, T, T), attn_dtype),
                       jax.ShapeDtypeStruct((B, H, T, S), attn_dtype)]
        out_specs += [pl.BlockSpec((1, H, tq, T), lambda b, t: (b, 0, t, 0)),
                      pl.BlockSpec((1, H, tq, S), lambda b, t: (b, 0, t, 0))]

    scratch_shapes = [pltpu.VMEM((H, T, dh), jnp.bfloat16),   # self-attn K
                      pltpu.VMEM((H, T, dh), jnp.bfloat16),   # self-attn V
                      pltpu.VMEM((H, S, dh), jnp.bfloat16),   # cross-attn K
                      pltpu.VMEM((H, S, dh), jnp.bfloat16)]   # cross-attn V

    outs = pl.pallas_call(
        kernel,
        out_shape=tuple(out_shapes),
        grid_spec=pltpu.PrefetchScalarGridSpec(
            num_scalar_prefetch=0,
            grid=(B, n_t),
            in_specs=in_specs,
            out_specs=out_specs,
            scratch_shapes=scratch_shapes),
        compiler_params=pltpu.CompilerParams(
            # t axis must be sequential (K/V scratch reuse); batch axis parallel.
            dimension_semantics=("parallel", "arbitrary"),
            vmem_limit_bytes=vmem_limit),
    )(x, encoder_output, *param_arrays)

    if return_attention:
        return outs            # (out, attn_weights_block1, attn_weights_block2)
    return outs[0]


# ------------------------------- reference (pure JAX) -------------------------------
def _ref_layernorm(x, g, b, eps):
    mu = jnp.mean(x, axis=-1, keepdims=True)
    var = jnp.mean((x - mu) ** 2, axis=-1, keepdims=True)
    return (x - mu) / jnp.sqrt(var + eps) * g + b


def _ref_mha(q, k, v, wq, bq, wk, bk, wv, bv, wo, bo, num_heads):
    B, Tq, D = q.shape
    Tk = k.shape[1]
    dh = D // num_heads
    def split(t, L):
        return t.reshape(B, L, num_heads, dh).transpose(0, 2, 1, 3)
    Q = split(q @ wq + bq, Tq)
    K = split(k @ wk + bk, Tk)
    V = split(v @ wv + bv, Tk)
    s = jnp.einsum('bhtd,bhsd->bhts', Q, K) / math.sqrt(dh)
    a = jax.nn.softmax(s, axis=-1)
    ctx = jnp.einsum('bhts,bhsd->bhtd', a, V)
    ctx = ctx.transpose(0, 2, 1, 3).reshape(B, Tq, D)
    return ctx @ wo + bo, a


def decoder_layer_ref(x, enc, p, num_heads, eps=1e-6):
    m1, a1 = _ref_mha(x, x, x, p['wq1'], p['bq1'], p['wk1'], p['bk1'],
                      p['wv1'], p['bv1'], p['wo1'], p['bo1'], num_heads)
    s1 = _ref_layernorm(x + m1, p['g1'], p['be1'], eps)
    m2, a2 = _ref_mha(s1, enc, enc, p['wq2'], p['bq2'], p['wk2'], p['bk2'],
                      p['wv2'], p['bv2'], p['wo2'], p['bo2'], num_heads)
    s2 = _ref_layernorm(s1 + m2, p['g2'], p['be2'], eps)
    ffn = jnp.maximum(s2 @ p['wf1'] + p['bf1'], 0.0) @ p['wf2'] + p['bf2']
    out = _ref_layernorm(s2 + ffn, p['g3'], p['be3'], eps)
    return out, a1, a2


def init_params(key, d_model, ffn_dim):
    keys = jax.random.split(key, 32)
    ki = iter(keys)
    def w(shape):
        return (0.02 * jax.random.normal(next(ki), shape)).astype(jnp.float32)
    p = {}
    for blk in ('1', '2'):
        for name in ('wq', 'wk', 'wv', 'wo'):
            p[name + blk] = w((d_model, d_model))
            p['b' + name[1] + blk] = w((1, d_model))
    p['wf1'] = w((d_model, ffn_dim)); p['bf1'] = w((1, ffn_dim))
    p['wf2'] = w((ffn_dim, d_model)); p['bf2'] = w((1, d_model))
    for i in ('1', '2', '3'):
        p['g' + i] = (1.0 + 0.1 * jax.random.normal(next(ki), (1, d_model))).astype(jnp.float32)
        p['be' + i] = w((1, d_model))
    return p


if __name__ == "__main__":
    B, T, S = 2, 8, 12          # batch, target seq len, input (encoder) seq len
    D, H, F = 32, 4, 64         # d_model, num_heads, fully_connected_dim

    key = jax.random.PRNGKey(0)
    kx, ke, kp = jax.random.split(key, 3)
    x = jax.random.normal(kx, (B, T, D), dtype=jnp.float32)
    enc = jax.random.normal(ke, (B, S, D), dtype=jnp.float32)
    params = init_params(kp, D, F)

    out, attn1, attn2 = decoder_layer(x, enc, params, num_heads=H)
    jax.block_until_ready(out)
    jax.block_until_ready(attn1)
    jax.block_until_ready(attn2)

    # sanity check against a pure-JAX f32 reference (kernel uses bf16 matmuls,
    # f32 accumulation, bf16 attention weights -> slightly looser tolerance)
    ro, ra1, ra2 = decoder_layer_ref(x, enc, params, num_heads=H)
    assert out.shape == (B, T, D)
    assert attn1.shape == (B, H, T, T)
    assert attn2.shape == (B, H, T, S)
    assert jnp.allclose(out, ro, atol=2e-2, rtol=2e-2)
    assert jnp.allclose(attn1.astype(jnp.float32), ra1, atol=2e-2, rtol=2e-2)
    assert jnp.allclose(attn2.astype(jnp.float32), ra2, atol=2e-2, rtol=2e-2)

    # output-only path: skips the O(H*T^2) attention-weight writeback entirely
    out_only = decoder_layer(x, enc, params, num_heads=H, return_attention=False)
    jax.block_until_ready(out_only)
    assert jnp.allclose(out_only, ro, atol=2e-2, rtol=2e-2)

    print("KERNEL_OK")
</pallas_src>

<mosaic_0001>
module attributes {stable_mosaic.version = 11 : i64} {
  func.func @kernel(%arg0: i32, %arg1: i32, %arg2: memref<1x8x32xf32, #tpu.memory_space<vmem>>, %arg3: memref<1x12x32xf32, #tpu.memory_space<vmem>>, %arg4: memref<32x32xbf16, #tpu.memory_space<vmem>>, %arg5: memref<1x32xf32, #tpu.memory_space<vmem>>, %arg6: memref<32x32xbf16, #tpu.memory_space<vmem>>, %arg7: memref<1x32xf32, #tpu.memory_space<vmem>>, %arg8: memref<32x32xbf16, #tpu.memory_space<vmem>>, %arg9: memref<1x32xf32, #tpu.memory_space<vmem>>, %arg10: memref<32x32xbf16, #tpu.memory_space<vmem>>, %arg11: memref<1x32xf32, #tpu.memory_space<vmem>>, %arg12: memref<32x32xbf16, #tpu.memory_space<vmem>>, %arg13: memref<1x32xf32, #tpu.memory_space<vmem>>, %arg14: memref<32x32xbf16, #tpu.memory_space<vmem>>, %arg15: memref<1x32xf32, #tpu.memory_space<vmem>>, %arg16: memref<32x32xbf16, #tpu.memory_space<vmem>>, %arg17: memref<1x32xf32, #tpu.memory_space<vmem>>, %arg18: memref<32x32xbf16, #tpu.memory_space<vmem>>, %arg19: memref<1x32xf32, #tpu.memory_space<vmem>>, %arg20: memref<32x64xbf16, #tpu.memory_space<vmem>>, %arg21: memref<1x64xf32, #tpu.memory_space<vmem>>, %arg22: memref<64x32xbf16, #tpu.memory_space<vmem>>, %arg23: memref<1x32xf32, #tpu.memory_space<vmem>>, %arg24: memref<1x32xf32, #tpu.memory_space<vmem>>, %arg25: memref<1x32xf32, #tpu.memory_space<vmem>>, %arg26: memref<1x32xf32, #tpu.memory_space<vmem>>, %arg27: memref<1x32xf32, #tpu.memory_space<vmem>>, %arg28: memref<1x32xf32, #tpu.memory_space<vmem>>, %arg29: memref<1x32xf32, #tpu.memory_space<vmem>>, %arg30: memref<1x8x32xf32, #tpu.memory_space<vmem>>, %arg31: memref<1x4x8x8xbf16, #tpu.memory_space<vmem>>, %arg32: memref<1x4x8x12xbf16, #tpu.memory_space<vmem>>, %arg33: memref<4x8x8xbf16, #tpu.memory_space<vmem>>, %arg34: memref<4x8x8xbf16, #tpu.memory_space<vmem>>, %arg35: memref<4x12x8xbf16, #tpu.memory_space<vmem>>, %arg36: memref<4x12x8xbf16, #tpu.memory_space<vmem>>) attributes {dimension_semantics = [#tpu.dimension_semantics<parallel>, #tpu.dimension_semantics<arbitrary>], iteration_bounds = array<i64: 2, 1>, scalar_prefetch = 0 : i64, scratch_operands = 4 : i64, tpu.core_type = #tpu.core_type<tc>, window_params = [{transform_indices = @transform_0, window_bounds = array<i64: 1, 8, 32>}, {transform_indices = @transform_1, window_bounds = array<i64: 1, 12, 32>}, {pipeline_mode = #tpu.pipeline_mode<synchronous>, transform_indices = @transform_2, window_bounds = array<i64: 32, 32>}, {pipeline_mode = #tpu.pipeline_mode<synchronous>, transform_indices = @transform_3, window_bounds = array<i64: 1, 32>}, {pipeline_mode = #tpu.pipeline_mode<synchronous>, transform_indices = @transform_4, window_bounds = array<i64: 32, 32>}, {pipeline_mode = #tpu.pipeline_mode<synchronous>, transform_indices = @transform_5, window_bounds = array<i64: 1, 32>}, {pipeline_mode = #tpu.pipeline_mode<synchronous>, transform_indices = @transform_6, window_bounds = array<i64: 32, 32>}, {pipeline_mode = #tpu.pipeline_mode<synchronous>, transform_indices = @transform_7, window_bounds = array<i64: 1, 32>}, {pipeline_mode = #tpu.pipeline_mode<synchronous>, transform_indices = @transform_8, window_bounds = array<i64: 32, 32>}, {pipeline_mode = #tpu.pipeline_mode<synchronous>, transform_indices = @transform_9, window_bounds = array<i64: 1, 32>}, {pipeline_mode = #tpu.pipeline_mode<synchronous>, transform_indices = @transform_10, window_bounds = array<i64: 32, 32>}, {pipeline_mode = #tpu.pipeline_mode<synchronous>, transform_indices = @transform_11, window_bounds = array<i64: 1, 32>}, {pipeline_mode = #tpu.pipeline_mode<synchronous>, transform_indices = @transform_12, window_bounds = array<i64: 32, 32>}, {pipeline_mode = #tpu.pipeline_mode<synchronous>, transform_indices = @transform_13, window_bounds = array<i64: 1, 32>}, {pipeline_mode = #tpu.pipeline_mode<synchronous>, transform_indices = @transform_14, window_bounds = array<i64: 32, 32>}, {pipeline_mode = #tpu.pipeline_mode<synchronous>, transform_indices = @transform_15, window_bounds = array<i64: 1, 32>}, {pipeline_mode = #tpu.pipeline_mode<synchronous>, transform_indices = @transform_16, window_bounds = array<i64: 32, 32>}, {pipeline_mode = #tpu.pipeline_mode<synchronous>, transform_indices = @transform_17, window_bounds = array<i64: 1, 32>}, {pipeline_mode = #tpu.pipeline_mode<synchronous>, transform_indices = @transform_18, window_bounds = array<i64: 32, 64>}, {pipeline_mode = #tpu.pipeline_mode<synchronous>, transform_indices = @transform_19, window_bounds = array<i64: 1, 64>}, {pipeline_mode = #tpu.pipeline_mode<synchronous>, transform_indices = @transform_20, window_bounds = array<i64: 64, 32>}, {pipeline_mode = #tpu.pipeline_mode<synchronous>, transform_indices = @transform_21, window_bounds = array<i64: 1, 32>}, {pipeline_mode = #tpu.pipeline_mode<synchronous>, transform_indices = @transform_22, window_bounds = array<i64: 1, 32>}, {pipeline_mode = #tpu.pipeline_mode<synchronous>, transform_indices = @transform_23, window_bounds = array<i64: 1, 32>}, {pipeline_mode = #tpu.pipeline_mode<synchronous>, transform_indices = @transform_24, window_bounds = array<i64: 1, 32>}, {pipeline_mode = #tpu.pipeline_mode<synchronous>, transform_indices = @transform_25, window_bounds = array<i64: 1, 32>}, {pipeline_mode = #tpu.pipeline_mode<synchronous>, transform_indices = @transform_26, window_bounds = array<i64: 1, 32>}, {pipeline_mode = #tpu.pipeline_mode<synchronous>, transform_indices = @transform_27, window_bounds = array<i64: 1, 32>}, {transform_indices = @transform_28, window_bounds = array<i64: 1, 8, 32>}, {transform_indices = @transform_29, window_bounds = array<i64: 1, 4, 8, 8>}, {transform_indices = @transform_30, window_bounds = array<i64: 1, 4, 8, 12>}]} {
    %c0_i32 = arith.constant 0 : i32
    %0 = arith.cmpi eq, %arg1, %c0_i32 : i32
    %1 = arith.extui %0 : i1 to i32
    %c0_i32_0 = arith.constant 0 : i32
    %2 = arith.cmpi ne, %1, %c0_i32_0 : i32
    scf.if %2 {
      %c0_90 = arith.constant 0 : index
      %c0_91 = arith.constant 0 : index
      %c0_92 = arith.constant 0 : index
      %166 = vector.load %arg2[%c0_90, %c0_91, %c0_92] : memref<1x8x32xf32, #tpu.memory_space<vmem>>, vector<1x8x32xf32>
      %167 = vector.shape_cast %166 : vector<1x8x32xf32> to vector<8x32xf32>
      %168 = arith.truncf %167 : vector<8x32xf32> to vector<8x32xbf16>
      %c0_93 = arith.constant 0 : index
      %c0_94 = arith.constant 0 : index
      %169 = vector.load %arg6[%c0_93, %c0_94] : memref<32x32xbf16, #tpu.memory_space<vmem>>, vector<32x32xbf16>
      %cst_95 = arith.constant dense<0.000000e+00> : vector<8x32xf32>
      %170 = tpu.matmul %168, %169, %cst_95 {dimension_numbers = #tpu.dot_dimension_numbers<[1], [0], [0], [1], [0, 0, 1, 1], [], []>} : vector<8x32xbf16>, vector<32x32xbf16>, vector<8x32xf32> -> vector<8x32xf32>
      %c0_96 = arith.constant 0 : index
      %c0_97 = arith.constant 0 : index
      %171 = vector.load %arg7[%c0_96, %c0_97] : memref<1x32xf32, #tpu.memory_space<vmem>>, vector<1x32xf32>
      %172 = vector.broadcast %171 : vector<1x32xf32> to vector<8x32xf32>
      %173 = arith.addf %170, %172 : vector<8x32xf32>
      %c0_98 = arith.constant 0 : index
      %c0_99 = arith.constant 0 : index
      %174 = vector.load %arg8[%c0_98, %c0_99] : memref<32x32xbf16, #tpu.memory_space<vmem>>, vector<32x32xbf16>
      %cst_100 = arith.constant dense<0.000000e+00> : vector<8x32xf32>
      %175 = tpu.matmul %168, %174, %cst_100 {dimension_numbers = #tpu.dot_dimension_numbers<[1], [0], [0], [1], [0, 0, 1, 1], [], []>} : vector<8x32xbf16>, vector<32x32xbf16>, vector<8x32xf32> -> vector<8x32xf32>
      %c0_101 = arith.constant 0 : index
      %c0_102 = arith.constant 0 : index
      %176 = vector.load %arg9[%c0_101, %c0_102] : memref<1x32xf32, #tpu.memory_space<vmem>>, vector<1x32xf32>
      %177 = vector.broadcast %176 : vector<1x32xf32> to vector<8x32xf32>
      %178 = arith.addf %175, %177 : vector<8x32xf32>
      %179 = vector.shape_cast %173 : vector<8x32xf32> to vector<8x4x8xf32>
      %180 = tpu.transpose %179, [1, 0, 2] : vector<8x4x8xf32> -> vector<4x8x8xf32>
      %181 = arith.truncf %180 : vector<4x8x8xf32> to vector<4x8x8xbf16>
      %c0_103 = arith.constant 0 : index
      %c0_104 = arith.constant 0 : index
      %c0_105 = arith.constant 0 : index
      %182 = vector.load %arg33[%c0_103, %c0_104, %c0_105] : memref<4x8x8xbf16, #tpu.memory_space<vmem>>, vector<4x8x8xbf16>
      tpu.vector_store %arg33[%c0_103, %c0_104, %c0_105], %181 {strides = array<i32>} : memref<4x8x8xbf16, #tpu.memory_space<vmem>>, vector<4x8x8xbf16>,
      %183 = vector.shape_cast %178 : vector<8x32xf32> to vector<8x4x8xf32>
      %184 = tpu.transpose %183, [1, 0, 2] : vector<8x4x8xf32> -> vector<4x8x8xf32>
      %185 = arith.truncf %184 : vector<4x8x8xf32> to vector<4x8x8xbf16>
      %c0_106 = arith.constant 0 : index
      %c0_107 = arith.constant 0 : index
      %c0_108 = arith.constant 0 : index
      %186 = vector.load %arg34[%c0_106, %c0_107, %c0_108] : memref<4x8x8xbf16, #tpu.memory_space<vmem>>, vector<4x8x8xbf16>
      tpu.vector_store %arg34[%c0_106, %c0_107, %c0_108], %185 {strides = array<i32>} : memref<4x8x8xbf16, #tpu.memory_space<vmem>>, vector<4x8x8xbf16>,
      %c0_109 = arith.constant 0 : index
      %c0_110 = arith.constant 0 : index
      %c0_111 = arith.constant 0 : index
      %187 = vector.load %arg3[%c0_109, %c0_110, %c0_111] : memref<1x12x32xf32, #tpu.memory_space<vmem>>, vector<1x12x32xf32>
      %188 = vector.shape_cast %187 : vector<1x12x32xf32> to vector<12x32xf32>
      %189 = arith.truncf %188 : vector<12x32xf32> to vector<12x32xbf16>
      %c0_112 = arith.constant 0 : index
      %c0_113 = arith.constant 0 : index
      %190 = vector.load %arg14[%c0_112, %c0_113] : memref<32x32xbf16, #tpu.memory_space<vmem>>, vector<32x32xbf16>
      %cst_114 = arith.constant dense<0.000000e+00> : vector<12x32xf32>
      %191 = tpu.matmul %189, %190, %cst_114 {dimension_numbers = #tpu.dot_dimension_numbers<[1], [0], [0], [1], [0, 0, 1, 1], [], []>} : vector<12x32xbf16>, vector<32x32xbf16>, vector<12x32xf32> -> vector<12x32xf32>
      %c0_115 = arith.constant 0 : index
      %c0_116 = arith.constant 0 : index
      %192 = vector.load %arg15[%c0_115, %c0_116] : memref<1x32xf32, #tpu.memory_space<vmem>>, vector<1x32xf32>
      %193 = vector.broadcast %192 : vector<1x32xf32> to vector<12x32xf32>
      %194 = arith.addf %191, %193 : vector<12x32xf32>
      %c0_117 = arith.constant 0 : index
      %c0_118 = arith.constant 0 : index
      %195 = vector.load %arg16[%c0_117, %c0_118] : memref<32x32xbf16, #tpu.memory_space<vmem>>, vector<32x32xbf16>
      %cst_119 = arith.constant dense<0.000000e+00> : vector<12x32xf32>
      %196 = tpu.matmul %189, %195, %cst_119 {dimension_numbers = #tpu.dot_dimension_numbers<[1], [0], [0], [1], [0, 0, 1, 1], [], []>} : vector<12x32xbf16>, vector<32x32xbf16>, vector<12x32xf32> -> vector<12x32xf32>
      %c0_120 = arith.constant 0 : index
      %c0_121 = arith.constant 0 : index
      %197 = vector.load %arg17[%c0_120, %c0_121] : memref<1x32xf32, #tpu.memory_space<vmem>>, vector<1x32xf32>
      %198 = vector.broadcast %197 : vector<1x32xf32> to vector<12x32xf32>
      %199 = arith.addf %196, %198 : vector<12x32xf32>
      %200 = vector.shape_cast %194 : vector<12x32xf32> to vector<12x4x8xf32>
      %201 = tpu.transpose %200, [1, 0, 2] : vector<12x4x8xf32> -> vector<4x12x8xf32>
      %202 = arith.truncf %201 : vector<4x12x8xf32> to vector<4x12x8xbf16>
      %c0_122 = arith.constant 0 : index
      %c0_123 = arith.constant 0 : index
      %c0_124 = arith.constant 0 : index
      %203 = vector.load %arg35[%c0_122, %c0_123, %c0_124] : memref<4x12x8xbf16, #tpu.memory_space<vmem>>, vector<4x12x8xbf16>
      tpu.vector_store %arg35[%c0_122, %c0_123, %c0_124], %202 {strides = array<i32>} : memref<4x12x8xbf16, #tpu.memory_space<vmem>>, vector<4x12x8xbf16>,
      %204 = vector.shape_cast %199 : vector<12x32xf32> to vector<12x4x8xf32>
      %205 = tpu.transpose %204, [1, 0, 2] : vector<12x4x8xf32> -> vector<4x12x8xf32>
      %206 = arith.truncf %205 : vector<4x12x8xf32> to vector<4x12x8xbf16>
      %c0_125 = arith.constant 0 : index
      %c0_126 = arith.constant 0 : index
      %c0_127 = arith.constant 0 : index
      %207 = vector.load %arg36[%c0_125, %c0_126, %c0_127] : memref<4x12x8xbf16, #tpu.memory_space<vmem>>, vector<4x12x8xbf16>
      tpu.vector_store %arg36[%c0_125, %c0_126, %c0_127], %206 {strides = array<i32>} : memref<4x12x8xbf16, #tpu.memory_space<vmem>>, vector<4x12x8xbf16>,
    } else {
    }
    %c8_i32 = arith.constant 8 : i32
    %3 = arith.muli %arg1, %c8_i32 : i32
    %4 = tpu.assume_multiple %3, 8 : i32
    %c0 = arith.constant 0 : index
    %5 = arith.index_cast %4 : i32 to index
    %c0_1 = arith.constant 0 : index
    %6 = vector.load %arg2[%c0, %5, %c0_1] : memref<1x8x32xf32, #tpu.memory_space<vmem>>, vector<1x8x32xf32>
    %7 = vector.shape_cast %6 : vector<1x8x32xf32> to vector<8x32xf32>
    %8 = arith.truncf %7 : vector<8x32xf32> to vector<8x32xbf16>
    %c0_2 = arith.constant 0 : index
    %c0_3 = arith.constant 0 : index
    %9 = vector.load %arg4[%c0_2, %c0_3] : memref<32x32xbf16, #tpu.memory_space<vmem>>, vector<32x32xbf16>
    %cst = arith.constant dense<0.000000e+00> : vector<8x32xf32>
    %10 = tpu.matmul %8, %9, %cst {dimension_numbers = #tpu.dot_dimension_numbers<[1], [0], [0], [1], [0, 0, 1, 1], [], []>} : vector<8x32xbf16>, vector<32x32xbf16>, vector<8x32xf32> -> vector<8x32xf32>
    %c0_4 = arith.constant 0 : index
    %c0_5 = arith.constant 0 : index
    %11 = vector.load %arg5[%c0_4, %c0_5] : memref<1x32xf32, #tpu.memory_space<vmem>>, vector<1x32xf32>
    %12 = vector.broadcast %11 : vector<1x32xf32> to vector<8x32xf32>
    %13 = arith.addf %10, %12 : vector<8x32xf32>
    %14 = vector.shape_cast %13 : vector<8x32xf32> to vector<8x4x8xf32>
    %15 = tpu.transpose %14, [1, 0, 2] : vector<8x4x8xf32> -> vector<4x8x8xf32>
    %16 = arith.truncf %15 : vector<4x8x8xf32> to vector<4x8x8xbf16>
    %c0_6 = arith.constant 0 : index
    %c0_7 = arith.constant 0 : index
    %c0_8 = arith.constant 0 : index
    %17 = vector.load %arg33[%c0_6, %c0_7, %c0_8] : memref<4x8x8xbf16, #tpu.memory_space<vmem>>, vector<4x8x8xbf16>
    %c0_9 = arith.constant 0 : index
    %c0_10 = arith.constant 0 : index
    %c0_11 = arith.constant 0 : index
    %18 = vector.load %arg34[%c0_9, %c0_10, %c0_11] : memref<4x8x8xbf16, #tpu.memory_space<vmem>>, vector<4x8x8xbf16>
    "tpu.trace_start"() <{level = 10 : i32, message = "hqd,hkd->hqk"}> : () -> ()
    %cst_12 = arith.constant dense<0.000000e+00> : vector<4x8x8xf32>
    %19 = tpu.matmul %16, %17, %cst_12 {dimension_numbers = #tpu.dot_dimension_numbers<[2], [2], [1], [1], [0, 0, 0, 1, 1, 1], [0], [0]>} : vector<4x8x8xbf16>, vector<4x8x8xbf16>, vector<4x8x8xf32> -> vector<4x8x8xf32>
    "tpu.trace_stop"() : () -> ()
    %cst_13 = arith.constant dense<0xFF800000> : vector<4x8xf32>
    %20 = vector.multi_reduction <maximumf>, %19, %cst_13 [2] : vector<4x8x8xf32> to vector<4x8xf32>
    %21 = vector.shape_cast %20 : vector<4x8xf32> to vector<4x8x1xf32>
    %22 = vector.broadcast %21 : vector<4x8x1xf32> to vector<4x8x8xf32>
    %23 = arith.subf %19, %22 : vector<4x8x8xf32>
    %24 = math.exp %23 : vector<4x8x8xf32>
    %cst_14 = arith.constant dense<0.000000e+00> : vector<4x8xf32>
    %25 = vector.multi_reduction <add>, %24, %cst_14 [2] : vector<4x8x8xf32> to vector<4x8xf32>
    %26 = vector.shape_cast %25 : vector<4x8xf32> to vector<4x8x1xf32>
    %27 = tpu.reciprocal %26 : vector<4x8x1xf32> -> vector<4x8x1xf32>
    %28 = vector.broadcast %27 : vector<4x8x1xf32> to vector<4x8x8xf32>
    %29 = arith.mulf %24, %28 : vector<4x8x8xf32>
    %30 = arith.truncf %29 : vector<4x8x8xf32> to vector<4x8x8xbf16>
    %c0_15 = arith.constant 0 : index
    %c0_16 = arith.constant 0 : index
    %c0_17 = arith.constant 0 : index
    %c0_18 = arith.constant 0 : index
    %31 = vector.load %arg31[%c0_15, %c0_16, %c0_17, %c0_18] : memref<1x4x8x8xbf16, #tpu.memory_space<vmem>>, vector<1x4x8x8xbf16>
    %32 = vector.shape_cast %31 : vector<1x4x8x8xbf16> to vector<4x8x8xbf16>
    %33 = vector.shape_cast %30 : vector<4x8x8xbf16> to vector<1x4x8x8xbf16>
    tpu.vector_store %arg31[%c0_15, %c0_16, %c0_17, %c0_18], %33 {strides = array<i32>} : memref<1x4x8x8xbf16, #tpu.memory_space<vmem>>, vector<1x4x8x8xbf16>,
    %34 = arith.truncf %29 : vector<4x8x8xf32> to vector<4x8x8xbf16>
    "tpu.trace_start"() <{level = 10 : i32, message = "hqk,hkd->hqd"}> : () -> ()
    %cst_19 = arith.constant dense<0.000000e+00> : vector<4x8x8xf32>
    %35 = tpu.matmul %34, %18, %cst_19 {dimension_numbers = #tpu.dot_dimension_numbers<[2], [1], [1], [2], [0, 0, 0, 1, 1, 2], [0], [0]>} : vector<4x8x8xbf16>, vector<4x8x8xbf16>, vector<4x8x8xf32> -> vector<4x8x8xf32>
    "tpu.trace_stop"() : () -> ()
    %36 = tpu.transpose %35, [1, 0, 2] : vector<4x8x8xf32> -> vector<8x4x8xf32>
    %37 = vector.shape_cast %36 : vector<8x4x8xf32> to vector<8x32xf32>
    %38 = arith.truncf %37 : vector<8x32xf32> to vector<8x32xbf16>
    %c0_20 = arith.constant 0 : index
    %c0_21 = arith.constant 0 : index
    %39 = vector.load %arg10[%c0_20, %c0_21] : memref<32x32xbf16, #tpu.memory_space<vmem>>, vector<32x32xbf16>
    %cst_22 = arith.constant dense<0.000000e+00> : vector<8x32xf32>
    %40 = tpu.matmul %38, %39, %cst_22 {dimension_numbers = #tpu.dot_dimension_numbers<[1], [0], [0], [1], [0, 0, 1, 1], [], []>} : vector<8x32xbf16>, vector<32x32xbf16>, vector<8x32xf32> -> vector<8x32xf32>
    %c0_23 = arith.constant 0 : index
    %c0_24 = arith.constant 0 : index
    %41 = vector.load %arg11[%c0_23, %c0_24] : memref<1x32xf32, #tpu.memory_space<vmem>>, vector<1x32xf32>
    %42 = vector.broadcast %41 : vector<1x32xf32> to vector<8x32xf32>
    %43 = arith.addf %40, %42 : vector<8x32xf32>
    %44 = arith.addf %7, %43 : vector<8x32xf32>
    %c0_25 = arith.constant 0 : index
    %c0_26 = arith.constant 0 : index
    %45 = vector.load %arg24[%c0_25, %c0_26] : memref<1x32xf32, #tpu.memory_space<vmem>>, vector<1x32xf32>
    %c0_27 = arith.constant 0 : index
    %c0_28 = arith.constant 0 : index
    %46 = vector.load %arg25[%c0_27, %c0_28] : memref<1x32xf32, #tpu.memory_space<vmem>>, vector<1x32xf32>
    %cst_29 = arith.constant dense<0.000000e+00> : vector<8xf32>
    %47 = vector.multi_reduction <add>, %44, %cst_29 [1] : vector<8x32xf32> to vector<8xf32>
    %48 = vector.shape_cast %47 : vector<8xf32> to vector<8x1xf32>
    %cst_30 = arith.constant 3.200000e+01 : f32
    %49 = vector.broadcast %cst_30 : f32 to vector<8x1xf32>
    %50 = arith.divf %48, %49 : vector<8x1xf32>
    %51 = vector.broadcast %50 : vector<8x1xf32> to vector<8x32xf32>
    %52 = arith.subf %44, %51 : vector<8x32xf32>
    %53 = arith.mulf %52, %52 : vector<8x32xf32>
    %cst_31 = arith.constant dense<0.000000e+00> : vector<8xf32>
    %54 = vector.multi_reduction <add>, %53, %cst_31 [1] : vector<8x32xf32> to vector<8xf32>
    %55 = vector.shape_cast %54 : vector<8xf32> to vector<8x1xf32>
    %cst_32 = arith.constant 3.200000e+01 : f32
    %56 = vector.broadcast %cst_32 : f32 to vector<8x1xf32>
    %57 = arith.divf %55, %56 : vector<8x1xf32>
    %cst_33 = arith.constant 9.99999997E-7 : f32
    %58 = vector.broadcast %cst_33 : f32 to vector<8x1xf32>
    %59 = arith.addf %57, %58 : vector<8x1xf32>
    %60 = math.rsqrt %59 : vector<8x1xf32>
    %61 = vector.broadcast %60 : vector<8x1xf32> to vector<8x32xf32>
    %62 = arith.mulf %52, %61 : vector<8x32xf32>
    %63 = vector.broadcast %45 : vector<1x32xf32> to vector<8x32xf32>
    %64 = arith.mulf %62, %63 : vector<8x32xf32>
    %65 = vector.broadcast %46 : vector<1x32xf32> to vector<8x32xf32>
    %66 = arith.addf %64, %65 : vector<8x32xf32>
    %67 = arith.truncf %66 : vector<8x32xf32> to vector<8x32xbf16>
    %c0_34 = arith.constant 0 : index
    %c0_35 = arith.constant 0 : index
    %68 = vector.load %arg12[%c0_34, %c0_35] : memref<32x32xbf16, #tpu.memory_space<vmem>>, vector<32x32xbf16>
    %cst_36 = arith.constant dense<0.000000e+00> : vector<8x32xf32>
    %69 = tpu.matmul %67, %68, %cst_36 {dimension_numbers = #tpu.dot_dimension_numbers<[1], [0], [0], [1], [0, 0, 1, 1], [], []>} : vector<8x32xbf16>, vector<32x32xbf16>, vector<8x32xf32> -> vector<8x32xf32>
    %c0_37 = arith.constant 0 : index
    %c0_38 = arith.constant 0 : index
    %70 = vector.load %arg13[%c0_37, %c0_38] : memref<1x32xf32, #tpu.memory_space<vmem>>, vector<1x32xf32>
    %71 = vector.broadcast %70 : vector<1x32xf32> to vector<8x32xf32>
    %72 = arith.addf %69, %71 : vector<8x32xf32>
    %73 = vector.shape_cast %72 : vector<8x32xf32> to vector<8x4x8xf32>
    %74 = tpu.transpose %73, [1, 0, 2] : vector<8x4x8xf32> -> vector<4x8x8xf32>
    %75 = arith.truncf %74 : vector<4x8x8xf32> to vector<4x8x8xbf16>
    %c0_39 = arith.constant 0 : index
    %c0_40 = arith.constant 0 : index
    %c0_41 = arith.constant 0 : index
    %76 = vector.load %arg35[%c0_39, %c0_40, %c0_41] : memref<4x12x8xbf16, #tpu.memory_space<vmem>>, vector<4x12x8xbf16>
    %c0_42 = arith.constant 0 : index
    %c0_43 = arith.constant 0 : index
    %c0_44 = arith.constant 0 : index
    %77 = vector.load %arg36[%c0_42, %c0_43, %c0_44] : memref<4x12x8xbf16, #tpu.memory_space<vmem>>, vector<4x12x8xbf16>
    "tpu.trace_start"() <{level = 10 : i32, message = "hqd,hkd->hqk"}> : () -> ()
    %cst_45 = arith.constant dense<0.000000e+00> : vector<4x8x12xf32>
    %78 = tpu.matmul %75, %76, %cst_45 {dimension_numbers = #tpu.dot_dimension_numbers<[2], [2], [1], [1], [0, 0, 0, 1, 1, 1], [0], [0]>} : vector<4x8x8xbf16>, vector<4x12x8xbf16>, vector<4x8x12xf32> -> vector<4x8x12xf32>
    "tpu.trace_stop"() : () -> ()
    %cst_46 = arith.constant dense<0xFF800000> : vector<4x8xf32>
    %79 = vector.multi_reduction <maximumf>, %78, %cst_46 [2] : vector<4x8x12xf32> to vector<4x8xf32>
    %80 = vector.shape_cast %79 : vector<4x8xf32> to vector<4x8x1xf32>
    %81 = vector.broadcast %80 : vector<4x8x1xf32> to vector<4x8x12xf32>
    %82 = arith.subf %78, %81 : vector<4x8x12xf32>
    %83 = math.exp %82 : vector<4x8x12xf32>
    %cst_47 = arith.constant dense<0.000000e+00> : vector<4x8xf32>
    %84 = vector.multi_reduction <add>, %83, %cst_47 [2] : vector<4x8x12xf32> to vector<4x8xf32>
    %85 = vector.shape_cast %84 : vector<4x8xf32> to vector<4x8x1xf32>
    %86 = tpu.reciprocal %85 : vector<4x8x1xf32> -> vector<4x8x1xf32>
    %87 = vector.broadcast %86 : vector<4x8x1xf32> to vector<4x8x12xf32>
    %88 = arith.mulf %83, %87 : vector<4x8x12xf32>
    %89 = arith.truncf %88 : vector<4x8x12xf32> to vector<4x8x12xbf16>
    %c0_48 = arith.constant 0 : index
    %c0_49 = arith.constant 0 : index
    %c0_50 = arith.constant 0 : index
    %c0_51 = arith.constant 0 : index
    %90 = vector.load %arg32[%c0_48, %c0_49, %c0_50, %c0_51] : memref<1x4x8x12xbf16, #tpu.memory_space<vmem>>, vector<1x4x8x12xbf16>
    %91 = vector.shape_cast %90 : vector<1x4x8x12xbf16> to vector<4x8x12xbf16>
    %92 = vector.shape_cast %89 : vector<4x8x12xbf16> to vector<1x4x8x12xbf16>
    tpu.vector_store %arg32[%c0_48, %c0_49, %c0_50, %c0_51], %92 {strides = array<i32>} : memref<1x4x8x12xbf16, #tpu.memory_space<vmem>>, vector<1x4x8x12xbf16>,
    %93 = arith.truncf %88 : vector<4x8x12xf32> to vector<4x8x12xbf16>
    "tpu.trace_start"() <{level = 10 : i32, message = "hqk,hkd->hqd"}> : () -> ()
    %cst_52 = arith.constant dense<0.000000e+00> : vector<4x8x8xf32>
    %94 = tpu.matmul %93, %77, %cst_52 {dimension_numbers = #tpu.dot_dimension_numbers<[2], [1], [1], [2], [0, 0, 0, 1, 1, 2], [0], [0]>} : vector<4x8x12xbf16>, vector<4x12x8xbf16>, vector<4x8x8xf32> -> vector<4x8x8xf32>
    "tpu.trace_stop"() : () -> ()
    %95 = tpu.transpose %94, [1, 0, 2] : vector<4x8x8xf32> -> vector<8x4x8xf32>
    %96 = vector.shape_cast %95 : vector<8x4x8xf32> to vector<8x32xf32>
    %97 = arith.truncf %96 : vector<8x32xf32> to vector<8x32xbf16>
    %c0_53 = arith.constant 0 : index
    %c0_54 = arith.constant 0 : index
    %98 = vector.load %arg18[%c0_53, %c0_54] : memref<32x32xbf16, #tpu.memory_space<vmem>>, vector<32x32xbf16>
    %cst_55 = arith.constant dense<0.000000e+00> : vector<8x32xf32>
    %99 = tpu.matmul %97, %98, %cst_55 {dimension_numbers = #tpu.dot_dimension_numbers<[1], [0], [0], [1], [0, 0, 1, 1], [], []>} : vector<8x32xbf16>, vector<32x32xbf16>, vector<8x32xf32> -> vector<8x32xf32>
    %c0_56 = arith.constant 0 : index
    %c0_57 = arith.constant 0 : index
    %100 = vector.load %arg19[%c0_56, %c0_57] : memref<1x32xf32, #tpu.memory_space<vmem>>, vector<1x32xf32>
    %101 = vector.broadcast %100 : vector<1x32xf32> to vector<8x32xf32>
    %102 = arith.addf %99, %101 : vector<8x32xf32>
    %103 = arith.addf %66, %102 : vector<8x32xf32>
    %c0_58 = arith.constant 0 : index
    %c0_59 = arith.constant 0 : index
    %104 = vector.load %arg26[%c0_58, %c0_59] : memref<1x32xf32, #tpu.memory_space<vmem>>, vector<1x32xf32>
    %c0_60 = arith.constant 0 : index
    %c0_61 = arith.constant 0 : index
    %105 = vector.load %arg27[%c0_60, %c0_61] : memref<1x32xf32, #tpu.memory_space<vmem>>, vector<1x32xf32>
    %cst_62 = arith.constant dense<0.000000e+00> : vector<8xf32>
    %106 = vector.multi_reduction <add>, %103, %cst_62 [1] : vector<8x32xf32> to vector<8xf32>
    %107 = vector.shape_cast %106 : vector<8xf32> to vector<8x1xf32>
    %cst_63 = arith.constant 3.200000e+01 : f32
    %108 = vector.broadcast %cst_63 : f32 to vector<8x1xf32>
    %109 = arith.divf %107, %108 : vector<8x1xf32>
    %110 = vector.broadcast %109 : vector<8x1xf32> to vector<8x32xf32>
    %111 = arith.subf %103, %110 : vector<8x32xf32>
    %112 = arith.mulf %111, %111 : vector<8x32xf32>
    %cst_64 = arith.constant dense<0.000000e+00> : vector<8xf32>
    %113 = vector.multi_reduction <add>, %112, %cst_64 [1] : vector<8x32xf32> to vector<8xf32>
    %114 = vector.shape_cast %113 : vector<8xf32> to vector<8x1xf32>
    %cst_65 = arith.constant 3.200000e+01 : f32
    %115 = vector.broadcast %cst_65 : f32 to vector<8x1xf32>
    %116 = arith.divf %114, %115 : vector<8x1xf32>
    %cst_66 = arith.constant 9.99999997E-7 : f32
    %117 = vector.broadcast %cst_66 : f32 to vector<8x1xf32>
    %118 = arith.addf %116, %117 : vector<8x1xf32>
    %119 = math.rsqrt %118 : vector<8x1xf32>
    %120 = vector.broadcast %119 : vector<8x1xf32> to vector<8x32xf32>
    %121 = arith.mulf %111, %120 : vector<8x32xf32>
    %122 = vector.broadcast %104 : vector<1x32xf32> to vector<8x32xf32>
    %123 = arith.mulf %121, %122 : vector<8x32xf32>
    %124 = vector.broadcast %105 : vector<1x32xf32> to vector<8x32xf32>
    %125 = arith.addf %123, %124 : vector<8x32xf32>
    %126 = arith.truncf %125 : vector<8x32xf32> to vector<8x32xbf16>
    %c0_67 = arith.constant 0 : index
    %c0_68 = arith.constant 0 : index
    %127 = vector.load %arg20[%c0_67, %c0_68] : memref<32x64xbf16, #tpu.memory_space<vmem>>, vector<32x64xbf16>
    %cst_69 = arith.constant dense<0.000000e+00> : vector<8x64xf32>
    %128 = tpu.matmul %126, %127, %cst_69 {dimension_numbers = #tpu.dot_dimension_numbers<[1], [0], [0], [1], [0, 0, 1, 1], [], []>} : vector<8x32xbf16>, vector<32x64xbf16>, vector<8x64xf32> -> vector<8x64xf32>
    %c0_70 = arith.constant 0 : index
    %c0_71 = arith.constant 0 : index
    %129 = vector.load %arg21[%c0_70, %c0_71] : memref<1x64xf32, #tpu.memory_space<vmem>>, vector<1x64xf32>
    %130 = vector.broadcast %129 : vector<1x64xf32> to vector<8x64xf32>
    %131 = arith.addf %128, %130 : vector<8x64xf32>
    %cst_72 = arith.constant 0.000000e+00 : f32
    %132 = vector.broadcast %cst_72 : f32 to vector<8x64xf32>
    %133 = arith.maximumf %131, %132 : vector<8x64xf32>
    %134 = arith.truncf %133 : vector<8x64xf32> to vector<8x64xbf16>
    %c0_73 = arith.constant 0 : index
    %c0_74 = arith.constant 0 : index
    %135 = vector.load %arg22[%c0_73, %c0_74] : memref<64x32xbf16, #tpu.memory_space<vmem>>, vector<64x32xbf16>
    %cst_75 = arith.constant dense<0.000000e+00> : vector<8x32xf32>
    %136 = tpu.matmul %134, %135, %cst_75 {dimension_numbers = #tpu.dot_dimension_numbers<[1], [0], [0], [1], [0, 0, 1, 1], [], []>} : vector<8x64xbf16>, vector<64x32xbf16>, vector<8x32xf32> -> vector<8x32xf32>
    %c0_76 = arith.constant 0 : index
    %c0_77 = arith.constant 0 : index
    %137 = vector.load %arg23[%c0_76, %c0_77] : memref<1x32xf32, #tpu.memory_space<vmem>>, vector<1x32xf32>
    %138 = vector.broadcast %137 : vector<1x32xf32> to vector<8x32xf32>
    %139 = arith.addf %136, %138 : vector<8x32xf32>
    %140 = arith.addf %125, %139 : vector<8x32xf32>
    %c0_78 = arith.constant 0 : index
    %c0_79 = arith.constant 0 : index
    %141 = vector.load %arg28[%c0_78, %c0_79] : memref<1x32xf32, #tpu.memory_space<vmem>>, vector<1x32xf32>
    %c0_80 = arith.constant 0 : index
    %c0_81 = arith.constant 0 : index
    %142 = vector.load %arg29[%c0_80, %c0_81] : memref<1x32xf32, #tpu.memory_space<vmem>>, vector<1x32xf32>
    %cst_82 = arith.constant dense<0.000000e+00> : vector<8xf32>
    %143 = vector.multi_reduction <add>, %140, %cst_82 [1] : vector<8x32xf32> to vector<8xf32>
    %144 = vector.shape_cast %143 : vector<8xf32> to vector<8x1xf32>
    %cst_83 = arith.constant 3.200000e+01 : f32
    %145 = vector.broadcast %cst_83 : f32 to vector<8x1xf32>
    %146 = arith.divf %144, %145 : vector<8x1xf32>
    %147 = vector.broadcast %146 : vector<8x1xf32> to vector<8x32xf32>
    %148 = arith.subf %140, %147 : vector<8x32xf32>
    %149 = arith.mulf %148, %148 : vector<8x32xf32>
    %cst_84 = arith.constant dense<0.000000e+00> : vector<8xf32>
    %150 = vector.multi_reduction <add>, %149, %cst_84 [1] : vector<8x32xf32> to vector<8xf32>
    %151 = vector.shape_cast %150 : vector<8xf32> to vector<8x1xf32>
    %cst_85 = arith.constant 3.200000e+01 : f32
    %152 = vector.broadcast %cst_85 : f32 to vector<8x1xf32>
    %153 = arith.divf %151, %152 : vector<8x1xf32>
    %cst_86 = arith.constant 9.99999997E-7 : f32
    %154 = vector.broadcast %cst_86 : f32 to vector<8x1xf32>
    %155 = arith.addf %153, %154 : vector<8x1xf32>
    %156 = math.rsqrt %155 : vector<8x1xf32>
    %157 = vector.broadcast %156 : vector<8x1xf32> to vector<8x32xf32>
    %158 = arith.mulf %148, %157 : vector<8x32xf32>
    %159 = vector.broadcast %141 : vector<1x32xf32> to vector<8x32xf32>
    %160 = arith.mulf %158, %159 : vector<8x32xf32>
    %161 = vector.broadcast %142 : vector<1x32xf32> to vector<8x32xf32>
    %162 = arith.addf %160, %161 : vector<8x32xf32>
    %c0_87 = arith.constant 0 : index
    %c0_88 = arith.constant 0 : index
    %c0_89 = arith.constant 0 : index
    %163 = vector.load %arg30[%c0_87, %c0_88, %c0_89] : memref<1x8x32xf32, #tpu.memory_space<vmem>>, vector<1x8x32xf32>
    %164 = vector.shape_cast %163 : vector<1x8x32xf32> to vector<8x32xf32>
    %165 = vector.shape_cast %162 : vector<8x32xf32> to vector<1x8x32xf32>
    tpu.vector_store %arg30[%c0_87, %c0_88, %c0_89], %165 {strides = array<i32>} : memref<1x8x32xf32, #tpu.memory_space<vmem>>, vector<1x8x32xf32>,
    return
  }
  func.func @transform_0(%arg0: i32, %arg1: i32) -> (i32, i32, i32) {
    %c0_i32 = arith.constant 0 : i32
    %c0_i32_0 = arith.constant 0 : i32
    %c0_i32_1 = arith.constant 0 : i32
    return %arg0, %c0_i32, %c0_i32_0 : i32, i32, i32
  }
  func.func @transform_1(%arg0: i32, %arg1: i32) -> (i32, i32, i32) {
    %c0_i32 = arith.constant 0 : i32
    %c0_i32_0 = arith.constant 0 : i32
    %c0_i32_1 = arith.constant 0 : i32
    return %arg0, %c0_i32, %c0_i32_0 : i32, i32, i32
  }
  func.func @transform_2(%arg0: i32, %arg1: i32) -> (i32, i32) {
    %c0_i32 = arith.constant 0 : i32
    %c0_i32_0 = arith.constant 0 : i32
    %c0_i32_1 = arith.constant 0 : i32
    return %c0_i32, %c0_i32_0 : i32, i32
  }
  func.func @transform_3(%arg0: i32, %arg1: i32) -> (i32, i32) {
    %c0_i32 = arith.constant 0 : i32
    %c0_i32_0 = arith.constant 0 : i32
    %c0_i32_1 = arith.constant 0 : i32
    return %c0_i32, %c0_i32_0 : i32, i32
  }
  func.func @transform_4(%arg0: i32, %arg1: i32) -> (i32, i32) {
    %c0_i32 = arith.constant 0 : i32
    %c0_i32_0 = arith.constant 0 : i32
    %c0_i32_1 = arith.constant 0 : i32
    return %c0_i32, %c0_i32_0 : i32, i32
  }
  func.func @transform_5(%arg0: i32, %arg1: i32) -> (i32, i32) {
    %c0_i32 = arith.constant 0 : i32
    %c0_i32_0 = arith.constant 0 : i32
    %c0_i32_1 = arith.constant 0 : i32
    return %c0_i32, %c0_i32_0 : i32, i32
  }
  func.func @transform_6(%arg0: i32, %arg1: i32) -> (i32, i32) {
    %c0_i32 = arith.constant 0 : i32
    %c0_i32_0 = arith.constant 0 : i32
    %c0_i32_1 = arith.constant 0 : i32
    return %c0_i32, %c0_i32_0 : i32, i32
  }
  func.func @transform_7(%arg0: i32, %arg1: i32) -> (i32, i32) {
    %c0_i32 = arith.constant 0 : i32
    %c0_i32_0 = arith.constant 0 : i32
    %c0_i32_1 = arith.constant 0 : i32
    return %c0_i32, %c0_i32_0 : i32, i32
  }
  func.func @transform_8(%arg0: i32, %arg1: i32) -> (i32, i32) {
    %c0_i32 = arith.constant 0 : i32
    %c0_i32_0 = arith.constant 0 : i32
    %c0_i32_1 = arith.constant 0 : i32
    return %c0_i32, %c0_i32_0 : i32, i32
  }
  func.func @transform_9(%arg0: i32, %arg1: i32) -> (i32, i32) {
    %c0_i32 = arith.constant 0 : i32
    %c0_i32_0 = arith.constant 0 : i32
    %c0_i32_1 = arith.constant 0 : i32
    return %c0_i32, %c0_i32_0 : i32, i32
  }
  func.func @transform_10(%arg0: i32, %arg1: i32) -> (i32, i32) {
    %c0_i32 = arith.constant 0 : i32
    %c0_i32_0 = arith.constant 0 : i32
    %c0_i32_1 = arith.constant 0 : i32
    return %c0_i32, %c0_i32_0 : i32, i32
  }
  func.func @transform_11(%arg0: i32, %arg1: i32) -> (i32, i32) {
    %c0_i32 = arith.constant 0 : i32
    %c0_i32_0 = arith.constant 0 : i32
    %c0_i32_1 = arith.constant 0 : i32
    return %c0_i32, %c0_i32_0 : i32, i32
  }
  func.func @transform_12(%arg0: i32, %arg1: i32) -> (i32, i32) {
    %c0_i32 = arith.constant 0 : i32
    %c0_i32_0 = arith.constant 0 : i32
    %c0_i32_1 = arith.constant 0 : i32
    return %c0_i32, %c0_i32_0 : i32, i32
  }
  func.func @transform_13(%arg0: i32, %arg1: i32) -> (i32, i32) {
    %c0_i32 = arith.constant 0 : i32
    %c0_i32_0 = arith.constant 0 : i32
    %c0_i32_1 = arith.constant 0 : i32
    return %c0_i32, %c0_i32_0 : i32, i32
  }
  func.func @transform_14(%arg0: i32, %arg1: i32) -> (i32, i32) {
    %c0_i32 = arith.constant 0 : i32
    %c0_i32_0 = arith.constant 0 : i32
    %c0_i32_1 = arith.constant 0 : i32
    return %c0_i32, %c0_i32_0 : i32, i32
  }
  func.func @transform_15(%arg0: i32, %arg1: i32) -> (i32, i32) {
    %c0_i32 = arith.constant 0 : i32
    %c0_i32_0 = arith.constant 0 : i32
    %c0_i32_1 = arith.constant 0 : i32
    return %c0_i32, %c0_i32_0 : i32, i32
  }
  func.func @transform_16(%arg0: i32, %arg1: i32) -> (i32, i32) {
    %c0_i32 = arith.constant 0 : i32
    %c0_i32_0 = arith.constant 0 : i32
    %c0_i32_1 = arith.constant 0 : i32
    return %c0_i32, %c0_i32_0 : i32, i32
  }
  func.func @transform_17(%arg0: i32, %arg1: i32) -> (i32, i32) {
    %c0_i32 = arith.constant 0 : i32
    %c0_i32_0 = arith.constant 0 : i32
    %c0_i32_1 = arith.constant 0 : i32
    return %c0_i32, %c0_i32_0 : i32, i32
  }
  func.func @transform_18(%arg0: i32, %arg1: i32) -> (i32, i32) {
    %c0_i32 = arith.constant 0 : i32
    %c0_i32_0 = arith.constant 0 : i32
    %c0_i32_1 = arith.constant 0 : i32
    return %c0_i32, %c0_i32_0 : i32, i32
  }
  func.func @transform_19(%arg0: i32, %arg1: i32) -> (i32, i32) {
    %c0_i32 = arith.constant 0 : i32
    %c0_i32_0 = arith.constant 0 : i32
    %c0_i32_1 = arith.constant 0 : i32
    return %c0_i32, %c0_i32_0 : i32, i32
  }
  func.func @transform_20(%arg0: i32, %arg1: i32) -> (i32, i32) {
    %c0_i32 = arith.constant 0 : i32
    %c0_i32_0 = arith.constant 0 : i32
    %c0_i32_1 = arith.constant 0 : i32
    return %c0_i32, %c0_i32_0 : i32, i32
  }
  func.func @transform_21(%arg0: i32, %arg1: i32) -> (i32, i32) {
    %c0_i32 = arith.constant 0 : i32
    %c0_i32_0 = arith.constant 0 : i32
    %c0_i32_1 = arith.constant 0 : i32
    return %c0_i32, %c0_i32_0 : i32, i32
  }
  func.func @transform_22(%arg0: i32, %arg1: i32) -> (i32, i32) {
    %c0_i32 = arith.constant 0 : i32
    %c0_i32_0 = arith.constant 0 : i32
    %c0_i32_1 = arith.constant 0 : i32
    return %c0_i32, %c0_i32_0 : i32, i32
  }
  func.func @transform_23(%arg0: i32, %arg1: i32) -> (i32, i32) {
    %c0_i32 = arith.constant 0 : i32
    %c0_i32_0 = arith.constant 0 : i32
    %c0_i32_1 = arith.constant 0 : i32
    return %c0_i32, %c0_i32_0 : i32, i32
  }
  func.func @transform_24(%arg0: i32, %arg1: i32) -> (i32, i32) {
    %c0_i32 = arith.constant 0 : i32
    %c0_i32_0 = arith.constant 0 : i32
    %c0_i32_1 = arith.constant 0 : i32
    return %c0_i32, %c0_i32_0 : i32, i32
  }
  func.func @transform_25(%arg0: i32, %arg1: i32) -> (i32, i32) {
    %c0_i32 = arith.constant 0 : i32
    %c0_i32_0 = arith.constant 0 : i32
    %c0_i32_1 = arith.constant 0 : i32
    return %c0_i32, %c0_i32_0 : i32, i32
  }
  func.func @transform_26(%arg0: i32, %arg1: i32) -> (i32, i32) {
    %c0_i32 = arith.constant 0 : i32
    %c0_i32_0 = arith.constant 0 : i32
    %c0_i32_1 = arith.constant 0 : i32
    return %c0_i32, %c0_i32_0 : i32, i32
  }
  func.func @transform_27(%arg0: i32, %arg1: i32) -> (i32, i32) {
    %c0_i32 = arith.constant 0 : i32
    %c0_i32_0 = arith.constant 0 : i32
    %c0_i32_1 = arith.constant 0 : i32
    return %c0_i32, %c0_i32_0 : i32, i32
  }
  func.func @transform_28(%arg0: i32, %arg1: i32) -> (i32, i32, i32) {
    %c0_i32 = arith.constant 0 : i32
    %c0_i32_0 = arith.constant 0 : i32
    return %arg0, %arg1, %c0_i32 : i32, i32, i32
  }
  func.func @transform_29(%arg0: i32, %arg1: i32) -> (i32, i32, i32, i32) {
    %c0_i32 = arith.constant 0 : i32
    %c0_i32_0 = arith.constant 0 : i32
    %c0_i32_1 = arith.constant 0 : i32
    return %arg0, %c0_i32, %arg1, %c0_i32_0 : i32, i32, i32, i32
  }
  func.func @transform_30(%arg0: i32, %arg1: i32) -> (i32, i32, i32, i32) {
    %c0_i32 = arith.constant 0 : i32
    %c0_i32_0 = arith.constant 0 : i32
    %c0_i32_1 = arith.constant 0 : i32
    return %arg0, %c0_i32, %arg1, %c0_i32_0 : i32, i32, i32, i32
  }
}

</mosaic_0001>

<bundles_post_ra>
// kernel: tpu_custom_call.1
= control target key start
LH: loop header
LB: loop body
LE: loop exit
PB: predicated region body
PF: predicated region fallthrough
CT: control target
= control target key end

     0   :  { %s5569_s6 = smov 1   ;;  %s5570_s10 = smov 2   ;;  %s6527_s0 = inlined_call_operand.smem [shape: u32[31], index: -1, kind: input, shape index: {}] }
   0x1   :  { %s5632_s5 = sld [smem:[%s6527_s0]]   ;;  %s5571_s14 = smov 3  }
   0x2   :  { %s5637_s9 = sld [smem:[%s6527_s0 + %s5569_s6]]   ;;  %s5572_s18 = smov 4  }
   0x3   :  { %s5642_s13 = sld [smem:[%s6527_s0 + %s5570_s10]]   ;;  %s5573_s22 = smov 5  }
   0x4   :  { %s5647_s17 = sld [smem:[%s6527_s0 + %s5571_s14]]   ;;  %s5574_s26 = smov 6  }
   0x5   :  { %s5652_s21 = sld [smem:[%s6527_s0 + %s5572_s18]]   ;;  %s5575_s30 = smov 7  }
   0x6   :  { %s5657_s25 = sld [smem:[%s6527_s0 + %s5573_s22]]   ;;  %s5576_s4 = smov 8  }
   0x7   :  { %6546 = sst [smem:[#allocation31_spill]] %s5632_s5  ;;  %s5577_s10 = smov 9  }
   0x8   :  { %s5662_s29 = sld [smem:[%s6527_s0 + %s5574_s26]]   ;;  %s5578_s15 = smov 10  }
   0x9   :  { %s5667_s3 = sld [smem:[%s6527_s0 + %s5575_s30]]   ;;  %s5579_s20 = smov 11  }
   0xa   :  { %6547 = sst [smem:[#allocation32_spill]] %s5647_s17  ;;  %s5580_s26 = smov 12  }
   0xb   :  { %s5672_s8 = sld [smem:[%s6527_s0 + %s5576_s4]]   ;;  %s5581_s1 = smov 13  }
   0xc   :  { %s5677_s14 = sld [smem:[%s6527_s0 + %s5577_s10]]   ;;  %s5582_s7 = smov 14  }
   0xd   :  { %s5682_s19 = sld [smem:[%s6527_s0 + %s5578_s15]]   ;;  %s5583_s15 = smov 15  }
   0xe   :  { %s5687_s24 = sld [smem:[%s6527_s0 + %s5579_s20]]   ;;  %s5584_s22 = smov 16  }
   0xf   :  { %6548 = sst [smem:[#allocation33_spill]] %s5667_s3  ;;  %s5585_s28 = smov 17  }
  0x10   :  { %s5692_s30 = sld [smem:[%s6527_s0 + %s5580_s26]]  }
  0x11   :  { %6549 = sst [smem:[#allocation34_spill]] %s5672_s8 }
  0x12   :  { %s5697_s6 = sld [smem:[%s6527_s0 + %s5581_s1]]  }
  0x13   :  { %6550 = sst [smem:[#allocation35_spill]] %s5682_s19 }
  0x14   :  { %s5702_s12 = sld [smem:[%s6527_s0 + %s5582_s7]]   ;;  %s5586_s7 = smov 18  }
  0x15   :  { %s5707_s20 = sld [smem:[%s6527_s0 + %s5583_s15]]   ;;  %s5587_s15 = smov 19  }
  0x16   :  { %s5712_s27 = sld [smem:[%s6527_s0 + %s5584_s22]]   ;;  %s5588_s22 = smov 20  }
  0x17   :  { %s5717_s4 = sld [smem:[%s6527_s0 + %s5585_s28]]   ;;  %s5589_s28 = smov 21  }
  0x18   :  { %6551 = sst [smem:[#allocation36_spill]] %s5697_s6 }
  0x19   :  { %s5722_s19 = sld [smem:[%s6527_s0 + %s5586_s7]]   ;;  %s5590_s7 = smov 22  }
  0x1a   :  { %s5732_s8 = sld [smem:[%s6527_s0 + %s5588_s22]]   ;;  %s5592_s22 = smov 24  }
  0x1b   :  { %6552 = sst [smem:[#allocation37_spill]] %s5707_s20 }
  0x1c   :  { %s5727_s20 = sld [smem:[%s6527_s0 + %s5587_s15]]   ;;  %s5591_s15 = smov 23  }
  0x1d   :  { %6553 = sst [smem:[#allocation38_spill]] %s5717_s4 }
  0x1e   :  { %s5737_s4 = sld [smem:[%s6527_s0 + %s5589_s28]]   ;;  %s5593_s28 = smov 25  }
  0x1f   :  { %s5742_s17 = sld [smem:[%s6527_s0 + %s5590_s7]]   ;;  %s5594_s7 = smov 26  }
  0x20   :  { %6555 = sst [smem:[#allocation40_spill]] %s5732_s8 }
  0x21   :  { %s5752_s8 = sld [smem:[%s6527_s0 + %s5592_s22]]   ;;  %s5596_s22 = smov 28  }
  0x22   :  { %6554 = sst [smem:[#allocation39_spill]] %s5727_s20 }
  0x23   :  { %s5747_s20 = sld [smem:[%s6527_s0 + %s5591_s15]]   ;;  %s5595_s15 = smov 27  }
  0x24   :  { %6556 = sst [smem:[#allocation41_spill]] %s5737_s4 }
  0x25   :  { %6557 = sst [smem:[#allocation42_spill]] %s5742_s17 }
  0x26   :  { %s5757_s4 = sld [smem:[%s6527_s0 + %s5593_s28]]   ;;  %s5597_s28 = smov 29  }
  0x27   :  { %6559 = sst [smem:[#allocation44_spill]] %s5752_s8 }
  0x28   :  { %s5762_s17 = sld [smem:[%s6527_s0 + %s5594_s7]]   ;;  %s5598_s7 = smov 30  }
  0x29   :  { %6558 = sst [smem:[#allocation43_spill]] %s5747_s20 }
  0x2a   :  { %s5767_s20 = sld [smem:[%s6527_s0 + %s5595_s15]]  }
  0x2b   :  { %s5772_s8 = sld [smem:[%s6527_s0 + %s5596_s22]]  }
  0x2c   :  { %6560 = sst [smem:[#allocation45_spill]] %s5757_s4 }
  0x2d   :  { %s5777_s4 = sld [smem:[%s6527_s0 + %s5597_s28]]  }
  0x2e   :  { %6561 = sst [smem:[#allocation46_spill]] %s5762_s17 }
  0x2f   :  { %s5782_s17 = sld [smem:[%s6527_s0 + %s5598_s7]]  }
  0x30   :  { %6562 = sst [smem:[#allocation47_spill]] %s5767_s20 }
  0x31   :  { %6563 = sst [smem:[#allocation48_spill]] %s5772_s8 }
  0x33   :  { %6564 = sst [smem:[#allocation49_spill]] %s5777_s4 }
  0x34   :  { %67 = vsyncpa [#allocation7], 0 }
  0x35   :  { %68 = vsyncpa [#allocation10], 0 }
  0x36   :  { %69 = vsyncpa [#allocation13], 0 }
  0x37   :  { %70 = vsyncpa [#allocation16], 0 }
  0x38   :  { %71 = vsyncpa [#allocation19], 0 }
  0x39   :  { %72 = vsyncpa [#allocation8], 0 }
  0x3a   :  { %74 = vsyncpa [#allocation8 + $0x1], 0 }
  0x3b   :  { %75 = vsyncpa [#allocation22], 0 }
  0x3c   :  { %77 = vsyncpa [#allocation22 + $0x1], 0  ;;  %s5784_s15 = smov 0   ;;  %s5786_s16 = smov 0  }
  0x3d   :  { %s5788_s18 = smov 0   ;;  %s5790_s22 = smov 0  }
  0x3e   :  { %s5792_s23 = smov 0   ;;  %s5794_s0 = smov 0  }
  0x3f LB: > { %s6565_s4 = sld [smem:[#allocation49_spill]]  ;;  %s5815_s26 = sadd.s32 4294967295, %s5567_s0   ;;  %s5547_s15 = sphi %s5784_s15, %s6617_s15   ;;  %s5567_s0 = sphi %s5794_s0, %s83_s0   ;;  %s5563_s23 = sphi %s5792_s23, %s6616_s23   ;;  %s5559_s22 = sphi %s5790_s22, %s6615_s22   ;;  %s5555_s18 = sphi %s5788_s18, %s6614_s18   ;;  %s5551_s16 = sphi %s5786_s16, %s6618_s16  }
  0x40   : > { %6566 = sst [smem:[#allocation50_spill]] %s5547_s15  ;;  %s6533_s28 = sadd.s32 4294967294, %s5567_s0  }
  0x41   : > { %6567 = sst [smem:[#allocation51_spill]] %s5555_s18  ;;  %s95_s1 = sadd.s32 1, %s5563_s23 }
  0x42   : > { %6568 = sst [smem:[#allocation52_spill]] %s5563_s23  ;;  %s702_s2 = sadd.s32 1, %s5555_s18 }
  0x43   : > { %p97_p0 = scmp.ge.s32.totalorder %s95_s1, 2  ;;  %p712_p1 = scmp.ne.s32.totalorder %s5555_s18, %s5551_s16 }
  0x44   : > { %p713_p2 = scmp.eq.s32.totalorder %s5815_s26, 1  ;;  %p718_p3 = scmp.ne.s32.totalorder %s5551_s16, %s5547_s15 }
  0x45   : > { %s6620_s1 = smov (%p97_p0, %s95_s1), 0  ;;  %p719_p5 = scmp.eq.s32.totalorder %s6533_s28, 1 }
  0x46   : > { %6569 = sst [smem:[#allocation53_spill]] %s6620_s1  ;;  %p5827_p4 = por %p713_p2, %p712_p1 }
  0x47   : > { %s697_s10 = ssub.s32 %s5563_s23, %s6620_s1  ;;  %p4545_p6 = scmp.ge.s32.totalorder %s5567_s0, 1 }
  0x48   : > { %s6570_s7 = scalar_select %p5827_p4, 1, 0 }
  0x49   : > { %p700_p7 = scmp.eq.s32.totalorder %s697_s10, 0  ;;  %p5836_p8 = por %p719_p5, %p718_p3 }
  0x4a   : > { %p782_p9 = scmp.lt.s32.totalorder %s5567_s0, 3  ;;  %p6538_p11 = scmp.eq.s32.totalorder %s5815_s26, 0 }
  0x4b   : > { %s6571_s11 = scalar_select %p5836_p8, 1, 0 }
  0x4c   : > { %s5842_s8 = scalar_select %p700_p7, %s5555_s18, %s702_s2  }
  0x4d   : > { %6572 = sst [smem:[#allocation54_spill]] %s6571_s11  ;;  %p5844_p10 = pnand %p4545_p6, %p782_p9 }
  0x4e   : > { %6573 = sst [smem:[#allocation55_spill]] %s5842_s8  ;;  %s5599_s20 = smov [#allocation9]  }
  0x4f   : > { %s6574_s15 = scalar_select %p5844_p10, 1, 0 }
  0x50   : > { %p4987_p12 = pneg %p5844_p10  ;;  %s818_s28 = sshll.u32 %s5599_s20, 4  ;;  %s819_s28 = int_to_ptr.vmem [resolvable:$true] %s818_s28 }
  0x51   : > { %s5600_s1 = smov [#allocation12]   ;;  %s5601_s2 = smov [#allocation15]  }
  0x52   : > { %s846_s10 = sshll.u32 %s5600_s1, 4  ;;  %p5853_p13 = pnand %p6538_p11, %p4987_p12  ;;  %s847_s10 = int_to_ptr.vmem [resolvable:$true] %s846_s10 }
  0x53   : > { %s870_s8 = sshll.u32 %s5601_s2, 4  ;;  %s5218_s11 = scalar_lea.vmem %s819_s28, 16  ;;  %s871_s8 = int_to_ptr.vmem [resolvable:$true] %s870_s8 }
  0x54   : > { %p5859_p0 = pneg %p5853_p13  ;;  %p5219_p1 = scmp.ne.s32.totalorder %s819_s28, %s5218_s11 }
  0x55   : > { %s5225_s20 = scalar_lea.vmem %s819_s28, 32  ;;  %p5226_p5 = scmp.lt.s32.totalorder %s819_s28, %s819_s28 }
  0x56   : > { %p5221_p2 = pnand %p5219_p1, %p5859_p0  ;;  %p5227_p6 = scmp.lt.s32.totalorder %s5225_s20, %s5218_s11 }
  0x58   : > { %p5222_p3 = pneg %p5221_p2  ;;  %p5228_p7 = por %p5227_p6, %p5226_p5 }
  0x5a   : > { %p5229_p9 = pnand %p5228_p7, %p5222_p3 }
  0x5c   : > { %5232 = shalt.err (!%p5229_p9)
}
  0x5d   : > { %s6577_s3 = sld [smem:[#allocation33_spill]]  ;;  %s5244_s1 = scalar_lea.vmem %s847_s10, 16 }
  0x5e   : > { %p5245_p12 = scmp.ne.s32.totalorder %s847_s10, %s5244_s1  ;;  %s5251_s2 = scalar_lea.vmem %s847_s10, 32 }
  0x5f   : > { %p5252_p4 = scmp.lt.s32.totalorder %s847_s10, %s847_s10  ;;  %p5253_p1 = scmp.lt.s32.totalorder %s5251_s2, %s5244_s1 }
  0x60   : > { %p5247_p11 = pnand %p5245_p12, %p5859_p0 }
  0x61   : > { %p5254_p2 = por %p5253_p1, %p5252_p4 }
  0x62   : > { %p5248_p8 = pneg %p5247_p11 }
  0x63   : > { %4993 = dma.hbm_to_vmem [thread:$0]  (!%p5853_p13), %s6577_s3, 16, %s819_s28, [#allocation10]  }
  0x64   : > { %p5255_p10 = pnand %p5254_p2, %p5248_p8 }
  0x66   : > { %5258 = shalt.err (!%p5255_p10)
}
  0x67   : > { %4999 = dma.hbm_to_vmem [thread:$0]  (!%p5853_p13), %s5687_s24, 16, %s847_s10, [#allocation13]  }
  0x68   : > { %s5270_s11 = scalar_lea.vmem %s871_s8, 16  ;;  %s5277_s28 = scalar_lea.vmem %s871_s8, 32 }
  0x69   : > { %p5271_p3 = scmp.ne.s32.totalorder %s871_s8, %s5270_s11  ;;  %p5278_p7 = scmp.lt.s32.totalorder %s871_s8, %s871_s8 }
  0x6a   : > { %p5279_p11 = scmp.lt.s32.totalorder %s5277_s28, %s5270_s11 }
  0x6b   : > { %p5273_p5 = pnand %p5271_p3, %p5859_p0 }
  0x6c   : > { %p5280_p9 = por %p5279_p11, %p5278_p7 }
  0x6d   : > { %p5274_p6 = pneg %p5273_p5 }
  0x6f   : > { %p5281_p12 = pnand %p5280_p9, %p5274_p6 }
  0x71   : > { %5284 = shalt.err (!%p5281_p12)
}
  0x72   : > { %s6578_s6 = sld [smem:[#allocation36_spill]]  ;;  %s5602_s20 = smov [#allocation6]  }
  0x73   : > { %s804_s1 = sshll.u32 %s5602_s20, 4  ;;  %s5603_s10 = smov [#allocation11]   ;;  %s805_s1 = int_to_ptr.vmem [resolvable:$true] %s804_s1 }
  0x74   : > { %s832_s2 = sshll.u32 %s5603_s10, 4  ;;  %s5296_s3 = scalar_lea.vmem %s805_s1, 16  ;;  %s833_s2 = int_to_ptr.vmem [resolvable:$true] %s832_s2 }
  0x75   : > { %p5297_p4 = scmp.ne.s32.totalorder %s805_s1, %s5296_s3  ;;  %s5303_s11 = scalar_lea.vmem %s805_s1, 32 }
  0x76   : > { %p5304_p1 = scmp.lt.s32.totalorder %s805_s1, %s805_s1  ;;  %p5305_p2 = scmp.lt.s32.totalorder %s5303_s11, %s5296_s3 }
  0x77   : > { %p5299_p8 = pnand %p5297_p4, %p5859_p0 }
  0x78   : > { %5005 = dma.hbm_to_vmem [thread:$0]  (!%p5853_p13), %s6578_s6, 16, %s871_s8, [#allocation16]  }
  0x79   : > { %p5300_p10 = pneg %p5299_p8  ;;  %p5306_p3 = por %p5305_p2, %p5304_p1 }
  0x7b   : > { %p5307_p5 = pnand %p5306_p3, %p5300_p10 }
  0x7d   : > { %5310 = shalt.err (!%p5307_p5)
}
  0x7e   : > { %4990 = dma.hbm_to_vmem [thread:$0]  (!%p5853_p13), %s5657_s25, 16, %s805_s1, [#allocation7]  }
  0x7f   : > { %s5322_s8 = scalar_lea.vmem %s833_s2, 16  ;;  %s5329_s28 = scalar_lea.vmem %s833_s2, 32 }
  0x80   : > { %p5323_p6 = scmp.ne.s32.totalorder %s833_s2, %s5322_s8  ;;  %p5330_p9 = scmp.lt.s32.totalorder %s833_s2, %s833_s2 }
  0x81   : > { %p5331_p12 = scmp.lt.s32.totalorder %s5329_s28, %s5322_s8 }
  0x82   : > { %p5325_p7 = pnand %p5323_p6, %p5859_p0 }
  0x83   : > { %p5332_p4 = por %p5331_p12, %p5330_p9 }
  0x84   : > { %p5326_p11 = pneg %p5325_p7 }
  0x86   : > { %p5333_p8 = pnand %p5332_p4, %p5326_p11 }
  0x88   : > { %5336 = shalt.err (!%p5333_p8)
}
  0x89   : > { %4996 = dma.hbm_to_vmem [thread:$0]  (!%p5853_p13), %s5677_s14, 16, %s833_s2, [#allocation10]  }
  0x8a   : > { %s5604_s3 = smov [#allocation14]  }
  0x8b   : > { %s856_s20 = sshll.u32 %s5604_s3, 4  ;;  %s857_s20 = int_to_ptr.vmem [resolvable:$true] %s856_s20 }
  0x8c   : > { %s5348_s1 = scalar_lea.vmem %s857_s20, 256  ;;  %p5356_p3 = scmp.lt.s32.totalorder %s857_s20, %s857_s20 }
  0x8d   : > { %p5349_p10 = scmp.ne.s32.totalorder %s857_s20, %s5348_s1  ;;  %p5357_p5 = scmp.lt.s32.totalorder %s5348_s1, %s5348_s1 }
  0x8f   : > { %p5351_p1 = pnand %p5349_p10, %p5859_p0  ;;  %p5358_p6 = por %p5357_p5, %p5356_p3 }
  0x91   : > { %p5352_p2 = pneg %p5351_p1 }
  0x93   : > { %p5359_p7 = pnand %p5358_p6, %p5352_p2 }
  0x95   : > { %5362 = shalt.err (!%p5359_p7)
}
  0x96   : > { %s5605_s10 = smov 64   ;;  %s5606_s11 = smov 4  }
  0x97   : > { %5002 = dma.hbm_to_vmem [thread:$0]  (!%p5853_p13), %s5692_s30, 256, %s857_s20, [#allocation13], %s5605_s10, %s5605_s10, %s5606_s11  }
  0x98   : > { %s5607_s2 = smov [#allocation17]   ;;  %s5608_s28 = smov [#allocation18]  }
  0x99   : > { %s886_s8 = sshll.u32 %s5607_s2, 4  ;;  %s902_s3 = sshll.u32 %s5608_s28, 4  ;;  %s887_s8 = int_to_ptr.vmem [resolvable:$true] %s886_s8  ;;  %s903_s3 = int_to_ptr.vmem [resolvable:$true] %s902_s3 }
  0x9a   : > { %s5374_s6 = scalar_lea.vmem %s887_s8, 256  ;;  %p5382_p4 = scmp.lt.s32.totalorder %s887_s8, %s887_s8 }
  0x9b   : > { %p5375_p11 = scmp.ne.s32.totalorder %s887_s8, %s5374_s6  ;;  %p5383_p8 = scmp.lt.s32.totalorder %s5374_s6, %s5374_s6 }
  0x9d   : > { %p5377_p9 = pnand %p5375_p11, %p5859_p0  ;;  %p5384_p10 = por %p5383_p8, %p5382_p4 }
  0x9f   : > { %p5378_p12 = pneg %p5377_p9 }
  0xa1   : > { %p5385_p1 = pnand %p5384_p10, %p5378_p12 }
  0xa3   : > { %5388 = shalt.err (!%p5385_p1)
}
  0xa4   : > { %5008 = dma.hbm_to_vmem [thread:$0]  (!%p5853_p13), %s5712_s27, 256, %s887_s8, [#allocation16], %s5605_s10, %s5605_s10, %s5606_s11  }
  0xa5   : > { %s5400_s20 = scalar_lea.vmem %s903_s3, 256  ;;  %p5408_p6 = scmp.lt.s32.totalorder %s903_s3, %s903_s3 }
  0xa6   : > { %p5401_p2 = scmp.ne.s32.totalorder %s903_s3, %s5400_s20  ;;  %p5409_p7 = scmp.lt.s32.totalorder %s5400_s20, %s5400_s20 }
  0xa8   : > { %p5403_p3 = pnand %p5401_p2, %p5859_p0  ;;  %p5410_p11 = por %p5409_p7, %p5408_p6 }
  0xaa   : > { %p5404_p5 = pneg %p5403_p3 }
  0xac   : > { %p5411_p9 = pnand %p5410_p11, %p5404_p5 }
  0xae   : > { %5414 = shalt.err (!%p5411_p9)
}
  0xaf   : > { %5011 = dma.hbm_to_vmem [thread:$0]  (!%p5853_p13), %s5722_s19, 256, %s903_s3, [#allocation19], %s5605_s10, %s5605_s10, %s5606_s11  }
  0xb0   : > { %p6579_p12 = scmp.ne.s32.totalorder %s6574_s15, 0 }
  0xb1   : > { %p6580_p4 = scmp.eq.s32.totalorder (!%p6579_p12), %s5815_s26, 0 }
  0xb2   : > { %960 = sbr.rel (%p6579_p12) target bundleno = 4327 (0x10e7), region = 132 }
  0xb7   : > { %5518 = dma.done.wait (%p6580_p4), [#allocation7], 16   ;;  %p6581_p0 = pmov %p6580_p4 }
  0xb9   : > { %5520 = vsyncadd (%p6581_p0), [#allocation7], 4294967280  ;;  %p6582_p8 = pmov %p6581_p0 }
  0xba   : > { %p6583_p10 = pmov %p6581_p0 }
  0xbb   : > { %5522 = dma.done.wait (%p6582_p8), [#allocation10], 32  }
  0xbc   : > { %5524 = vsyncadd (%p6583_p10), [#allocation10], 4294967264  ;;  %p6584_p1 = pmov %p6581_p0 }
  0xbd   : > { %p6585_p13 = pmov %p6581_p0 }
  0xbe   : > { %5526 = dma.done.wait (%p6584_p1), [#allocation13], 272  }
  0xbf   : > { %5528 = vsyncadd (%p6585_p13), [#allocation13], 4294967024  ;;  %p6586_p2 = pmov %p6581_p0 }
  0xc0   : > { %p6587_p3 = pmov %p6581_p0 }
  0xc1   : > { %5530 = dma.done.wait (%p6586_p2), [#allocation16], 272  }
  0xc2   : > { %5532 = vsyncadd (%p6587_p3), [#allocation16], 4294967024  ;;  %p6588_p5 = pmov %p6581_p0 }
  0xc3   : > { %p6589_p6 = pmov %p6581_p0 }
  0xc4   : > { %5534 = dma.done.wait (%p6588_p5), [#allocation19], 256  }
  0xc5   : > { %5536 = vsyncadd (%p6589_p6), [#allocation19], 4294967040  ;;  %s6590_s5 = sld [smem:[#allocation31_spill]]  ;;  %p1080_p7 = scmp.lt.s32.totalorder %s5559_s22, 1  ;;  %v5609_v0 = vmov 0.0   ;;  %vm5610_vm0 = vmmov 0   ;;  %v1241_v36 = vlaneseq }
  0xc6   : > { %4769 = vmatprep.subr.bf16.mxu0 %v5609_v0  ;;  %4773 = vmatprep.mubr.msk.bf16.mxu0 %vm5610_vm0, %v5609_v0  ;;  %v5139_v1 = vld [vmem:[%s5652_s21 + $0x8] sm:$0xff]   ;;  %v5140_v2 = vld [vmem:[%s5652_s21] sm:$0xff]   ;;  %vm1119_vm1 = vcmask 261120   ;;  %v5141_v5 = vld [vmem:[#allocation14 + $0x8] sm:$0xff]   ;;  %s5611_s10 = smov 104   ;;  %s5612_s11 = smov 120  }
  0xc7   : > { %s1081_s6 = scalar_select %p1080_p7, %s5559_s22, 1  ;;  %4777 = vmatprep.subr.bf16.mxu1 %v5609_v0  ;;  %4781 = vmatprep.mubr.msk.bf16.mxu1 %vm5610_vm0, %v5609_v0  ;;  %v5142_v6 = vld [vmem:[#allocation14] sm:$0xff]   ;;  %v5144_v11 = vld [vmem:[%s5642_s13] sm:$0xff]   ;;  %v5981_v23 = vld [vmem:[#allocation15] ss:$0 sm:$0xff]  ;;  %v1242_v40 = vshrl.u32 %v1241_v36, 7 }
  0xc8   : > { %4770 = vmatpush3.bf16.msra.mxu0 %v5139_v1  ;;  %v5143_v9 = vld [vmem:[%s5642_s13 + $0x8] sm:$0xff]   ;;  %v4570_v12 = vld [vmem:[#allocation6] ss:$0 sm:$0xff]  ;;  %s6591_s2 = sld [smem:[#allocation32_spill]]  ;;  %s5613_s8 = smov 112   ;;  %vm1376_vm2 = vcmask 60416  }
  0xc9   : > { %s4567_s15 = sshll.u32 %s1081_s6, 3  ;;  %s4686_s23 = sshll.u32 %s1081_s6, 4  ;;  %4771 = vmatprep.subr.bf16.mxu0 %v5609_v0  ;;  %v5145_v13 = vld [vmem:[%s5662_s29 + $0x8] sm:$0xff]   ;;  %v5146_v18 = vld [vmem:[%s5662_s29] sm:$0xff]   ;;  %v5614_v34 = vmov 1983009808  }
  0xca   : > { %s1088_s1 = scalar_lea.vmem %s5637_s9, %s4686_s23  ;;  %4778 = vmatpush3.bf16.msra.mxu1 %v5145_v13  ;;  %v5147_v21 = vld [vmem:[%s5702_s12 + $0x8] sm:$0xff]   ;;  %v5148_v25 = vld [vmem:[%s5702_s12] sm:$0xff]   ;;  %v1239_v35 = vunpack.c.l.s4 %v5614_v34  ;;  %v5615_v37 = vmov 1934713408   ;;  %vm2427_vm3 = vcmask 64512   ;;  %vm2668_vm4 = vcmask 1043456  }
  0xcb   : > { %s1083_s18 = scalar_lea.vmem %s6590_s5, %s4567_s15  ;;  %v1535_v7 = vld [vmem:[%s1088_s1] sm:$0xff]  ;;  %v1536_v8 = vld [vmem:[%s1088_s1 + $0x8] sm:$0xf]  ;;  %4779 = vmatprep.subr.bf16.mxu1 %v5609_v0  ;;  %v1271_v38 = vunpack.c.l.s4 %v5615_v37  ;;  %s6114_s28 = sand.u32 1, %s5551_s16   ;;  %vm2999_vm5 = vcmask 130048   ;;  %vm3001_vm6 = vcmask 195584  }
  0xcc   : > { %v5945_v3 = vld [vmem:[%s1083_s18] sm:$0xff]  ;;  %4772 = vmatpush3.bf16.msra.mxu0 %v5140_v2  ;;  %v1537_v10 = vpack.c.bf16 %v1536_v8, %v1535_v7  ;;  %v1240_v39 = vunpack.c.0.s8 %v1239_v35  ;;  %s4565_s3 = sshll.u32 %s6114_s28, 4  ;;  %s6592_s6 = sld [smem:[#allocation34_spill]]  ;;  %vm1926_vm7 = vcmask 58368   ;;  %vm3538_vm8 = vcmask 97280  }
  0xcd   : > { %v1095_v4 = vpack.c.bf16 %v5945_v3, %v5945_v3  ;;  %4785 = vmatprep.subr.bf16.mxu0 %v5609_v0  ;;  %v1272_v43 = vunpack.c.0.s8 %v1271_v38  ;;  %s6121_s20 = scalar_lea.vmem [#allocation21], %s4565_s3  ;;  %s5616_s15 = smov 16   ;;  %vm3600_vm9 = vcmask 1045504   ;;  %vm3587_vm10 = vcmask 93184  }
  0xce   : > { %4780 = vmatpush3.bf16.msra.mxu1 %v5146_v18  ;;  %v4612_v28 = vld [vmem:[%s6591_s2] ss:$0 sm:$0xff]  ;;  %v6000_v44 = vsub.s32 %v1240_v39, %v1242_v40  ;;  %s5617_s18 = smov 8   ;;  %s6541_s23 = smov 24   ;;  %vm4153_vm11 = vcmask 523264  }
  0xcf   : > { %4774 = vmatmul.mubr.msk.bf16.vlgmr.msra.gmra.mxu0 %vm1119_vm1, %v1095_v4  ;;  %4793 = vmatprep.subr.bf16.mxu1 %v5609_v0  ;;  %v6002_v50 = vsub.s32 %v1272_v43, %v1242_v40  ;;  %s6593_s1 = sld [smem:[#allocation35_spill]]  ;;  %p6604_p9 = scmp.ne.s32.totalorder %s6570_s7, 0 }
  0xd0   : > { %4786 = vmatpush3.bf16.msra.mxu0 %v5141_v5  ;;  %4789 = vmatprep.mubr.msk.bf16.mxu0 %vm5610_vm0, %v5609_v0  ;;  %s6594_s2 = sld [smem:[#allocation42_spill]] }
  0xd1   : > { %4787 = vmatprep.subr.bf16.mxu0 %v5609_v0  ;;  %4782 = vmatmul.mubr.msk.bf16.vlgmr.msra.gmra.mxu1 %vm1119_vm1, %v1095_v4 }
  0xd2   : > { %4794 = vmatpush3.bf16.msra.mxu1 %v5147_v21  ;;  %4797 = vmatprep.mubr.msk.bf16.mxu1 %vm5610_vm0, %v5609_v0 }
  0xd3   : > { %4795 = vmatprep.subr.bf16.mxu1 %v5609_v0 }
  0xd4   : > { %4788 = vmatpush3.bf16.msra.mxu0 %v5142_v6 }
  0xd5   : > { %4801 = vmatprep.subr.bf16.mxu0 %v5609_v0 }
  0xd6   : > { %4796 = vmatpush3.bf16.msra.mxu1 %v5148_v25 }
  0xd7   : > { %4790 = vmatmul.mubr.msk.bf16.vlgmr.msra.gmra.mxu0 %vm1119_vm1, %v1537_v10  ;;  %4809 = vmatprep.subr.bf16.mxu1 %v5609_v0 }
  0xd8   : > { %4802 = vmatpush3.bf16.msra.mxu0 %v5143_v9  ;;  %4805 = vmatprep.mubr.msk.bf16.mxu0 %vm5610_vm0, %v5609_v0 }
  0xd9   : > { %4803 = vmatprep.subr.bf16.mxu0 %v5609_v0  ;;  %4798 = vmatmul.mubr.msk.bf16.vlgmr.msra.gmra.mxu1 %vm1119_vm1, %v1537_v10 }
  0xda   : > { %4811 = vmatprep.mubr.msk.bf16.mxu1 %vm5610_vm0, %v5609_v0 }
  0xdc   : > { %4804 = vmatpush3.bf16.msra.mxu0 %v5144_v11 }
  0xdd   : > { %4815 = vmatprep.subr.bf16.mxu0 %v5609_v0 }
  0xdf   : > { %4806 = vmatmul.mubr.msk.bf16.vlgmr.msra.gmra.mxu0 %vm1119_vm1, %v1095_v4 }
  0xe0   : > { %4817 = vmatprep.mubr.msk.bf16.mxu0 %vm5610_vm0, %v5609_v0 }
 0x18f   : > { %v1157_v14 = vpop.f32.mrf.mxu0 }
 0x190   : > { %v1158_v15 = vadd.f32 %v4570_v12, %v1157_v14 }
 0x191   : > { %v4775_v16 = vpop.f32.mrf.mxu0 }
 0x192   : > { %1233 = vrot.lane.b32.xlu1 %v1158_v15, %s5611_s10  ;;  %1227 = vrot.lane.b32.xlu0 %v1158_v15, %s5612_s11 }
 0x193   : > { %v1160_v17 = vpop.f32.mrf.mxu0 }
 0x195   : > { %v4776_v19 = vpop.f32.mrf.mxu0 }
 0x196   : > { %1230 = vrot.lane.b32.xlu0 %v1158_v15, %s5613_s8 }
 0x197   : > { %v5974_v20 = vpop.f32.mrf.mxu0 }
 0x199   : > { %v4791_v22 = vpop.f32.mrf.mxu0 }
 0x19b   : > { %v1601_v24 = vpop.f32.mrf.mxu0 }
 0x19c   : > { %v5985_v26 = vadd.f32 %v5981_v23, %v1601_v24 }
 0x19d   : > { %v4792_v27 = vpop.f32.mrf.mxu0 }
 0x19f   : > { %v2263_v29 = vpop.f32.mrf.mxu0 }
 0x1a0   : > { %v5989_v30 = vadd.f32 %v4612_v28, %v2263_v29 }
 0x1a1   : > { %v4807_v31 = vpop.f32.mrf.mxu0 }
 0x1a2   : > { %2273 = vrot.lane.b32.xlu0 %v5989_v30, %s5613_s8  ;;  %2270 = vrot.lane.b32.xlu1 %v5989_v30, %s5612_s11 }
 0x1a3   : > { %v2266_v32 = vpop.f32.mrf.mxu0 }
 0x1a5   : > { %v4808_v33 = vpop.f32.mrf.mxu0 }
 0x1a6   : > { %2276 = vrot.lane.b32.xlu1 %v5989_v30, %s5611_s10 }
 0x204   : > { %v1234_v41 = vpop.permute.xlu1 %1233  ;;  %v1228_v42 = vpop.permute.xlu0 %1227 }
 0x205   : > { %v1252_v45 = vcombine.low %v1228_v42, %v1234_v41  ;;  %v1253_v46 = vcombine.high %v1228_v42, %v1234_v41 }
 0x207   : > { %v1260_v51 = vrot.slane %v1252_v45, %v6000_v44  ;;  %v1267_v52 = vrot.slane %v1253_v46, %v6000_v44 }
 0x208   : > { %v1231_v47 = vpop.permute.xlu0 %1230 }
 0x209   : > { %v1236_v48 = vcombine.low %v1158_v15, %v1231_v47  ;;  %v1237_v49 = vcombine.high %v1158_v15, %v1231_v47 }
 0x20b   : > { %v1244_v53 = vrot.slane %v1236_v48, %v6000_v44  ;;  %v1251_v54 = vrot.slane %v1237_v49, %v6000_v44 }
 0x20d   : > { %v1268_v55 = vcombine.low %v1244_v53, %v1260_v51  ;;  %v1269_v56 = vcombine.high %v1244_v53, %v1260_v51  ;;  %v1284_v57 = vcombine.low %v1251_v54, %v1267_v52  ;;  %v1285_v58 = vcombine.high %v1251_v54, %v1267_v52 }
 0x20f   : > { %v1276_v59 = vrot.slane %v1268_v55, %v6002_v50  ;;  %v1283_v60 = vrot.slane %v1269_v56, %v6002_v50  ;;  %v1292_v61 = vrot.slane %v1284_v57, %v6002_v50  ;;  %v1299_v62 = vrot.slane %v1285_v58, %v6002_v50 }
 0x211   : > { %v1304_v63 = vcombine.low %v1276_v59, %v1283_v60  ;;  %v4578_v1 = vcombine.high %v1276_v59, %v1283_v60  ;;  %v1320_v2 = vcombine.low %v1292_v61, %v1299_v62  ;;  %v4579_v4 = vcombine.high %v1292_v61, %v1299_v62 }
 0x213   : > { %v1311_v5 = vrot.slane %v1304_v63, %v6000_v44  ;;  %v1319_v6 = vrot.slane %v4578_v1, %v6000_v44  ;;  %v1327_v7 = vrot.slane %v1320_v2, %v6000_v44  ;;  %v1335_v8 = vrot.slane %v4579_v4, %v6000_v44 }
 0x214   : > { %v2271_v9 = vpop.permute.xlu1 %2270  ;;  %v2274_v14 = vpop.permute.xlu0 %2273 }
 0x215   : > { %v1336_v10 = vcombine.low %v1311_v5, %v1319_v6  ;;  %v1337_v11 = vcombine.high %v1311_v5, %v1319_v6  ;;  %v1352_v12 = vcombine.low %v1327_v7, %v1335_v8  ;;  %v1353_v13 = vcombine.high %v1327_v7, %v1335_v8 }
 0x216   : > { %v2279_v19 = vcombine.low %v5989_v30, %v2274_v14  ;;  %v2280_v21 = vcombine.high %v5989_v30, %v2274_v14 }
 0x217   : > { %v1344_v15 = vrot.slane %v1336_v10, %v6002_v50  ;;  %v1351_v16 = vrot.slane %v1337_v11, %v6002_v50  ;;  %v1360_v17 = vrot.slane %v1352_v12, %v6002_v50  ;;  %v1367_v18 = vrot.slane %v1353_v13, %v6002_v50 }
 0x218   : > { %v2277_v22 = vpop.permute.xlu1 %2276  ;;  %v2287_v36 = vrot.slane %v2279_v19, %v6000_v44  ;;  %v2294_v37 = vrot.slane %v2280_v21, %v6000_v44  ;;  %v1220_v19 = vpop.f32.mrf.mxu1 }
 0x219   : > { %v1368_v24 = vcombine.low %v1344_v15, %v1360_v17  ;;  %v1369_v25 = vcombine.high %v1344_v15, %v1360_v17  ;;  %v1370_v27 = vcombine.low %v1351_v16, %v1367_v18  ;;  %v1371_v28 = vcombine.high %v1351_v16, %v1367_v18 }
 0x21a   : > { %v2295_v29 = vcombine.low %v2271_v9, %v2277_v22  ;;  %v2296_v31 = vcombine.high %v2271_v9, %v2277_v22  ;;  %v4783_v21 = vpop.f32.mrf.mxu1 }
 0x21b   : > { %v1372_v32 = vpack.c.bf16 %v1368_v24, %v1368_v24  ;;  %v1373_v33 = vpack.c.bf16 %v1369_v25, %v1369_v25  ;;  %v1374_v34 = vpack.c.bf16 %v1370_v27, %v1370_v27  ;;  %v1375_v35 = vpack.c.bf16 %v1371_v28, %v1371_v28 }
 0x21c   : > { %v2303_v38 = vrot.slane %v2295_v29, %v6000_v44  ;;  %v2310_v30 = vrot.slane %v2296_v31, %v6000_v44  ;;  %v1223_v22 = vpop.f32.mrf.mxu1 }
 0x21d   : > { %1377 = vst.msk [vmem:[#allocation2] sm:$0xf] %vm1376_vm2, %v1372_v32  ;;  %1378 = vst.msk [vmem:[#allocation2 + $0x4] sm:$0xf] %vm1376_vm2, %v1373_v33 }
 0x21e   : > { %1379 = vst.msk [vmem:[#allocation2 + $0x8] sm:$0xf] %vm1376_vm2, %v1374_v34  ;;  %1380 = vst.msk [vmem:[#allocation2 + $0xc] sm:$0xf] %vm1376_vm2, %v1375_v35  ;;  %v2311_v39 = vcombine.low %v2287_v36, %v2303_v38  ;;  %v2312_v40 = vcombine.high %v2287_v36, %v2303_v38  ;;  %v2327_v41 = vcombine.low %v2294_v37, %v2310_v30  ;;  %v4784_v24 = vpop.f32.mrf.mxu1 }
 0x21f   : > { %v2328_v42 = vcombine.high %v2294_v37, %v2310_v30 }
 0x220   : > { %v2319_v43 = vrot.slane %v2311_v39, %v6002_v50  ;;  %v2326_v45 = vrot.slane %v2312_v40, %v6002_v50  ;;  %v2335_v46 = vrot.slane %v2327_v41, %v6002_v50  ;;  %v6062_v25 = vpop.f32.mrf.mxu1 }
 0x221   : > { %v2342_v47 = vrot.slane %v2328_v42, %v6002_v50 }
 0x222   : > { %v2347_v48 = vcombine.low %v2319_v43, %v2326_v45  ;;  %v4616_v49 = vcombine.high %v2319_v43, %v2326_v45  ;;  %v4799_v27 = vpop.f32.mrf.mxu1 }
 0x223   : > { %v2363_v51 = vcombine.low %v2335_v46, %v2342_v47  ;;  %v4617_v52 = vcombine.high %v2335_v46, %v2342_v47 }
 0x224   : > { %v2354_v53 = vrot.slane %v2347_v48, %v6000_v44  ;;  %v2362_v54 = vrot.slane %v4616_v49, %v6000_v44  ;;  %v2419_v57 = vld [vmem:[#allocation2] sm:$0xf]  ;;  %v2420_v58 = vld [vmem:[#allocation2 + $0x4] sm:$0xf]  ;;  %v6064_v28 = vpop.f32.mrf.mxu1 }
 0x225   : > { %v2370_v55 = vrot.slane %v2363_v51, %v6000_v44  ;;  %v2378_v56 = vrot.slane %v4617_v52, %v6000_v44  ;;  %v2432_v59 = vsel %vm2427_vm3, %v2419_v57, 0  ;;  %v2478_v60 = vsel %vm2427_vm3, %v2420_v58, 0  ;;  %v2421_v7 = vld [vmem:[#allocation2 + $0x8] sm:$0xf]  ;;  %v2422_v8 = vld [vmem:[#allocation2 + $0xc] sm:$0xf] }
 0x226   : > { %v2379_v61 = vcombine.low %v2354_v53, %v2362_v54  ;;  %4810 = vmatpush3.bf16.xpose.msra.mxu1 %v2432_v59  ;;  %4816 = vmatpush3.bf16.xpose.msra.mxu0 %v2478_v60  ;;  %v2380_v63 = vcombine.high %v2354_v53, %v2362_v54  ;;  %v2524_v13 = vsel %vm2427_vm3, %v2421_v7, 0  ;;  %v2570_v14 = vsel %vm2427_vm3, %v2422_v8, 0  ;;  %v4800_v29 = vpop.f32.mrf.mxu1  ;;  %v4574_v49 = vld [vmem:[#allocation9] ss:$0 sm:$0xff] }
 0x227   : > { %v2395_v62 = vcombine.low %v2370_v55, %v2378_v56  ;;  %4821 = vmatprep.subr.bf16.mxu1 %v5609_v0  ;;  %v2396_v1 = vcombine.high %v2370_v55, %v2378_v56  ;;  %4827 = vmatprep.subr.bf16.mxu0 %v5609_v0  ;;  %v1221_v53 = vadd.f32 %v4574_v49, %v1220_v19 }
 0x228   : > { %v2387_v2 = vrot.slane %v2379_v61, %v6002_v50  ;;  %v2394_v11 = vrot.slane %v2380_v63, %v6002_v50 }
 0x229   : > { %v2403_v4 = vrot.slane %v2395_v62, %v6002_v50  ;;  %v2410_v12 = vrot.slane %v2396_v1, %v6002_v50 }
 0x22b   : > { %v2411_v5 = vcombine.low %v2387_v2, %v2403_v4  ;;  %v2412_v6 = vcombine.high %v2387_v2, %v2403_v4  ;;  %v2413_v15 = vcombine.low %v2394_v11, %v2410_v12  ;;  %v2414_v16 = vcombine.high %v2394_v11, %v2410_v12 }
 0x22d   : > { %v2415_v9 = vpack.c.bf16 %v2411_v5, %v2411_v5  ;;  %v2416_v10 = vpack.c.bf16 %v2412_v6, %v2412_v6  ;;  %v2417_v17 = vpack.c.bf16 %v2413_v15, %v2413_v15  ;;  %v2418_v18 = vpack.c.bf16 %v2414_v16, %v2414_v16 }
 0x22f   : > { %4812 = vmatmul.mubr.msk.bf16.vlgmr.msra.gmra.mxu1 %vm2427_vm3, %v2415_v9  ;;  %4818 = vmatmul.mubr.msk.bf16.vlgmr.msra.gmra.mxu0 %vm2427_vm3, %v2416_v10 }
 0x230   : > { %4822 = vmatpush3.bf16.xpose.msra.mxu1 %v2524_v13  ;;  %4828 = vmatpush3.bf16.xpose.msra.mxu0 %v2570_v14 }
 0x231   : > { %4823 = vmatprep.mubr.msk.bf16.mxu1 %vm5610_vm0, %v5609_v0  ;;  %4829 = vmatprep.mubr.msk.bf16.mxu0 %vm5610_vm0, %v5609_v0 }
 0x232   : > { %4833 = vmatprep.subr.bf16.mxu1 %v5609_v0  ;;  %4839 = vmatprep.subr.bf16.mxu0 %v5609_v0 }
 0x237   : > { %4824 = vmatmul.mubr.msk.bf16.vlgmr.msra.gmra.mxu1 %vm2427_vm3, %v2417_v17  ;;  %4830 = vmatmul.mubr.msk.bf16.vlgmr.msra.gmra.mxu0 %vm2427_vm3, %v2418_v18 }
 0x238   : > { %4835 = vmatprep.mubr.msk.bf16.mxu1 %vm5610_vm0, %v5609_v0  ;;  %4841 = vmatprep.mubr.msk.bf16.mxu0 %vm5610_vm0, %v5609_v0 }
 0x2ef   : > { %v2468_v31 = vpop.f32.mrf.mxu1  ;;  %v2514_v32 = vpop.f32.mrf.mxu0 }
 0x2f0   : > { %v2612_v33 = vsel %vm2427_vm3, %v2468_v31, -inf  ;;  %v2615_v34 = vsel %vm2427_vm3, %v2514_v32, -inf }
 0x2f1   : > { %2613 = vmax.xlane.f32.xlu0 %v2612_v33  ;;  %v4813_v35 = vpop.f32.mrf.mxu1  ;;  %2616 = vmax.xlane.f32.xlu1 %v2615_v34  ;;  %v4819_v36 = vpop.f32.mrf.mxu0 }
 0x2f3   : > { %v2471_v37 = vpop.f32.mrf.mxu1  ;;  %v2517_v38 = vpop.f32.mrf.mxu0 }
 0x2f5   : > { %v4814_v30 = vpop.f32.mrf.mxu1  ;;  %v4820_v39 = vpop.f32.mrf.mxu0 }
 0x2f7   : > { %v2560_v40 = vpop.f32.mrf.mxu1  ;;  %v2606_v41 = vpop.f32.mrf.mxu0 }
 0x2f8   : > { %v2618_v42 = vsel %vm2427_vm3, %v2560_v40, -inf  ;;  %v2621_v48 = vsel %vm2427_vm3, %v2606_v41, -inf }
 0x2f9   : > { %2619 = vmax.xlane.f32.xlu0 %v2618_v42  ;;  %v4825_v43 = vpop.f32.mrf.mxu1  ;;  %v4831_v45 = vpop.f32.mrf.mxu0 }
 0x2fb   : > { %v2563_v46 = vpop.f32.mrf.mxu1  ;;  %v2609_v47 = vpop.f32.mrf.mxu0 }
 0x2fd   : > { %v4826_v51 = vpop.f32.mrf.mxu1  ;;  %2622 = vmax.xlane.f32.xlu0 %v2621_v48  ;;  %v4832_v52 = vpop.f32.mrf.mxu0 }
 0x302   : > { %1382 = vrot.lane.b32.xlu1 %v1221_v53, %s5612_s11 }
 0x306   : > { %1388 = vrot.lane.b32.xlu1 %v1221_v53, %s5611_s10 }
 0x313   : > { %1385 = vrot.lane.b32.xlu0 %v1221_v53, %s5613_s8 }
 0x37a   : > { %v2614_v54 = vpop.xlane.xlu0 %2613  ;;  %v2617_v55 = vpop.xlane.xlu1 %2616 }
 0x37b   : > { %v2624_v56 = vsub.f32 %v2468_v31, %v2614_v54  ;;  %v2625_v57 = vsub.f32 %v2514_v32, %v2617_v55 }
 0x37d   : > { %v2628_v58 = vmul.f32 1.442695, %v2624_v56  ;;  %v2630_v59 = vmul.f32 1.442695, %v2625_v57 }
 0x37e   : > { %v1383_v60 = vpop.permute.xlu1 %1382 }
 0x37f   : > { %5169 = vpow2.f32 %v2628_v58 }
 0x380   : > { %5171 = vpow2.f32 %v2630_v59 }
 0x382   : > { %v2620_v61 = vpop.xlane.xlu0 %2619  ;;  %v1389_v1 = vpop.permute.xlu1 %1388 }
 0x383   : > { %v2626_v62 = vsub.f32 %v2560_v40, %v2620_v61  ;;  %v1407_v5 = vcombine.low %v1383_v60, %v1389_v1  ;;  %v1408_v6 = vcombine.high %v1383_v60, %v1389_v1 }
 0x385   : > { %v2632_v63 = vmul.f32 1.442695, %v2626_v62  ;;  %v1415_v12 = vrot.slane %v1407_v5, %v6000_v44  ;;  %v1422_v14 = vrot.slane %v1408_v6, %v6000_v44 }
 0x386   : > { %v2623_v2 = vpop.xlane.xlu0 %2622 }
 0x387   : > { %5173 = vpow2.f32 %v2632_v63  ;;  %v2627_v4 = vsub.f32 %v2606_v41, %v2623_v2 }
 0x389   : > { %v2634_v7 = vmul.f32 1.442695, %v2627_v4 }
 0x38a   : > { %v1386_v8 = vpop.permute.xlu0 %1385 }
 0x38b   : > { %5175 = vpow2.f32 %v2634_v7  ;;  %v1391_v9 = vcombine.low %v1221_v53, %v1386_v8  ;;  %v1392_v10 = vcombine.high %v1221_v53, %v1386_v8 }
 0x38c   : > { %v6073_v11 = vpop.eup %5169 }
 0x38d   : > { %v6076_v13 = vpop.eup %5171  ;;  %v1399_v15 = vrot.slane %v1391_v9, %v6000_v44  ;;  %v1406_v16 = vrot.slane %v1392_v10, %v6000_v44  ;;  %v2636_v17 = vsel %vm2427_vm3, %v6073_v11, 0.0 }
 0x38e   : > { %2637 = vadd.xlane.f32.xlu1 %v2636_v17  ;;  %v2639_v18 = vsel %vm2427_vm3, %v6076_v13, 0.0 }
 0x38f   : > { %v1423_v19 = vcombine.low %v1399_v15, %v1415_v12  ;;  %v1424_v21 = vcombine.high %v1399_v15, %v1415_v12  ;;  %v1439_v22 = vcombine.low %v1406_v16, %v1422_v14  ;;  %v1440_v24 = vcombine.high %v1406_v16, %v1422_v14  ;;  %2640 = vadd.xlane.f32.xlu0 %v2639_v18 }
 0x391   : > { %v1431_v27 = vrot.slane %v1423_v19, %v6002_v50  ;;  %v1438_v29 = vrot.slane %v1424_v21, %v6002_v50  ;;  %v1447_v31 = vrot.slane %v1439_v22, %v6002_v50  ;;  %v1454_v32 = vrot.slane %v1440_v24, %v6002_v50 }
 0x393   : > { %v1459_v33 = vcombine.low %v1431_v27, %v1438_v29  ;;  %v4580_v34 = vcombine.high %v1431_v27, %v1438_v29  ;;  %v1475_v35 = vcombine.low %v1447_v31, %v1454_v32  ;;  %v4581_v36 = vcombine.high %v1447_v31, %v1454_v32 }
 0x394   : > { %v6089_v37 = vpop.eup %5173 }
 0x395   : > { %v1466_v38 = vrot.slane %v1459_v33, %v6000_v44  ;;  %v1474_v30 = vrot.slane %v4580_v34, %v6000_v44  ;;  %v1482_v39 = vrot.slane %v1475_v35, %v6000_v44  ;;  %v1490_v40 = vrot.slane %v4581_v36, %v6000_v44 }
 0x396   : > { %v2642_v41 = vsel %vm2427_vm3, %v6089_v37, 0.0 }
 0x397   : > { %v1491_v42 = vcombine.low %v1466_v38, %v1474_v30  ;;  %v1492_v43 = vcombine.high %v1466_v38, %v1474_v30  ;;  %v1507_v45 = vcombine.low %v1482_v39, %v1490_v40  ;;  %v1508_v46 = vcombine.high %v1482_v39, %v1490_v40  ;;  %2643 = vadd.xlane.f32.xlu0 %v2642_v41 }
 0x398   : > { %v6097_v47 = vpop.eup %5175 }
 0x399   : > { %v1499_v48 = vrot.slane %v1491_v42, %v6002_v50  ;;  %v1506_v49 = vrot.slane %v1492_v43, %v6002_v50  ;;  %v1515_v51 = vrot.slane %v1507_v45, %v6002_v50  ;;  %v1522_v52 = vrot.slane %v1508_v46, %v6002_v50 }
 0x39a   : > { %v2645_v53 = vsel %vm2427_vm3, %v6097_v47, 0.0 }
 0x39b   : > { %v1523_v54 = vcombine.low %v1499_v48, %v1515_v51  ;;  %v1524_v55 = vcombine.high %v1499_v48, %v1515_v51  ;;  %v1525_v56 = vcombine.low %v1506_v49, %v1522_v52  ;;  %v1526_v57 = vcombine.high %v1506_v49, %v1522_v52  ;;  %2646 = vadd.xlane.f32.xlu1 %v2645_v53 }
 0x39d   : > { %v1527_v58 = vpack.c.bf16 %v1523_v54, %v1523_v54  ;;  %v1528_v59 = vpack.c.bf16 %v1524_v55, %v1524_v55  ;;  %v1529_v60 = vpack.c.bf16 %v1525_v56, %v1525_v56  ;;  %v1530_v61 = vpack.c.bf16 %v1526_v57, %v1526_v57 }
 0x39f   : > { %1531 = vst.msk [vmem:[#allocation3] sm:$0xf] %vm1376_vm2, %v1527_v58  ;;  %1532 = vst.msk [vmem:[#allocation3 + $0x4] sm:$0xf] %vm1376_vm2, %v1528_v59  ;;  %v5149_v58 = vld [vmem:[%s6592_s6 + $0x8] sm:$0xff]  }
 0x3a0   : > { %1533 = vst.msk [vmem:[#allocation3 + $0x8] sm:$0xf] %vm1376_vm2, %v1529_v60  ;;  %1534 = vst.msk [vmem:[#allocation3 + $0xc] sm:$0xf] %vm1376_vm2, %v1530_v61 }
 0x3a6   : > { %v2423_v62 = vld [vmem:[#allocation3] sm:$0xf]  ;;  %v2424_v63 = vld [vmem:[#allocation3 + $0x4] sm:$0xf] }
 0x3a7   : > { %v2670_v1 = vsel %vm2668_vm4, %v2423_v62, 0  ;;  %v2716_v2 = vsel %vm2668_vm4, %v2424_v63, 0  ;;  %v2425_v14 = vld [vmem:[#allocation3 + $0x8] sm:$0xf]  ;;  %v2426_v16 = vld [vmem:[#allocation3 + $0xc] sm:$0xf] }
 0x3a8   : > { %4834 = vmatpush3.bf16.msra.mxu1 %v2670_v1  ;;  %4840 = vmatpush3.bf16.msra.mxu0 %v2716_v2  ;;  %v2762_v18 = vsel %vm2668_vm4, %v2425_v14, 0 }
 0x3a9   : > { %4845 = vmatprep.subr.bf16.mxu1 %v5609_v0  ;;  %4851 = vmatprep.subr.bf16.mxu0 %v5609_v0 }
 0x417   : > { %v2638_v4 = vpop.xlane.xlu1 %2637 }
 0x418   : > { %5177 = vrcp.f32 %v2638_v4  ;;  %v2641_v5 = vpop.xlane.xlu0 %2640 }
 0x419   : > { %5179 = vrcp.f32 %v2641_v5 }
 0x420   : > { %v2644_v6 = vpop.xlane.xlu0 %2643 }
 0x421   : > { %5181 = vrcp.f32 %v2644_v6  ;;  %v5150_v6 = vld [vmem:[%s6592_s6] sm:$0xff]  }
 0x424   : > { %v2647_v7 = vpop.xlane.xlu1 %2646 }
 0x425   : > { %v5178_v8 = vpop.eup %5177  ;;  %5183 = vrcp.f32 %v2647_v7 }
 0x426   : > { %v5180_v9 = vpop.eup %5179  ;;  %v2652_v10 = vmul.f32 %v5178_v8, %v6073_v11  ;;  %v2808_v11 = vsel %vm2668_vm4, %v2426_v16, 0 }
 0x427   : > { %v2653_v12 = vmul.f32 %v5180_v9, %v6076_v13 }
 0x428   : > { %v2656_v15 = vpack.c.bf16 %v2652_v10, %v2652_v10 }
 0x429   : > { %v2657_v17 = vpack.c.bf16 %v2653_v12, %v2653_v12 }
 0x42a   : > { %2661 = vst.msk [vmem:[%s6121_s20] sm:$0xf] %vm1376_vm2, %v2656_v15  ;;  %4836 = vmatmul.mubr.msk.bf16.vlgmr.msra.gmra.mxu1 %vm2427_vm3, %v2656_v15 }
 0x42b   : > { %2662 = vst.msk [vmem:[%s6121_s20 + $0x4] sm:$0xf] %vm1376_vm2, %v2657_v17  ;;  %4842 = vmatmul.mubr.msk.bf16.vlgmr.msra.gmra.mxu0 %vm2427_vm3, %v2657_v17  ;;  %4846 = vmatpush3.bf16.msra.mxu1 %v2762_v18 }
 0x42c   : > { %4852 = vmatpush3.bf16.msra.mxu0 %v2808_v11  ;;  %4847 = vmatprep.mubr.msk.bf16.mxu1 %vm5610_vm0, %v5609_v0 }
 0x42d   : > { %4853 = vmatprep.mubr.msk.bf16.mxu0 %vm5610_vm0, %v5609_v0  ;;  %4857 = vmatprep.subr.bf16.mxu1 %v5609_v0 }
 0x42e   : > { %v5182_v13 = vpop.eup %5181  ;;  %4865 = vmatprep.subr.bf16.mxu0 %v5609_v0 }
 0x42f   : > { %v2654_v19 = vmul.f32 %v5182_v13, %v6089_v37 }
 0x431   : > { %v2658_v21 = vpack.c.bf16 %v2654_v19, %v2654_v19 }
 0x432   : > { %v5184_v22 = vpop.eup %5183 }
 0x433   : > { %2663 = vst.msk [vmem:[%s6121_s20 + $0x8] sm:$0xf] %vm1376_vm2, %v2658_v21  ;;  %4848 = vmatmul.mubr.msk.bf16.vlgmr.msra.gmra.mxu1 %vm2427_vm3, %v2658_v21  ;;  %v2655_v24 = vmul.f32 %v5184_v22, %v6097_v47 }
 0x434   : > { %4861 = vmatprep.mubr.msk.bf16.mxu1 %vm5610_vm0, %v5609_v0  ;;  %4858 = vmatpush3.bf16.msra.mxu1 %v5149_v58 }
 0x435   : > { %v2659_v27 = vpack.c.bf16 %v2655_v24, %v2655_v24  ;;  %4859 = vmatprep.subr.bf16.mxu1 %v5609_v0 }
 0x437   : > { %2664 = vst.msk [vmem:[%s6121_s20 + $0xc] sm:$0xf] %vm1376_vm2, %v2659_v27  ;;  %4854 = vmatmul.mubr.msk.bf16.vlgmr.msra.gmra.mxu0 %vm2427_vm3, %v2659_v27 }
 0x438   : > { %4869 = vmatprep.mubr.msk.bf16.mxu0 %vm5610_vm0, %v5609_v0  ;;  %4860 = vmatpush3.bf16.msra.mxu1 %v5150_v6 }
 0x439   : > { %4873 = vmatprep.subr.bf16.mxu1 %v5609_v0 }
 0x4ea   : > { %v2706_v29 = vpop.f32.mrf.mxu1 }
 0x4eb   : > { %v2752_v31 = vpop.f32.mrf.mxu0 }
 0x4ec   : > { %v4837_v32 = vpop.f32.mrf.mxu1 }
 0x4ed   : > { %v4843_v33 = vpop.f32.mrf.mxu0 }
 0x4ee   : > { %v2709_v34 = vpop.f32.mrf.mxu1 }
 0x4ef   : > { %v2755_v35 = vpop.f32.mrf.mxu0 }
 0x4f0   : > { %v4838_v36 = vpop.f32.mrf.mxu1 }
 0x4f1   : > { %v4844_v37 = vpop.f32.mrf.mxu0  ;;  %v4628_v36 = vld [vmem:[#allocation11] ss:$0 sm:$0xff] }
 0x4f3   : > { %v2798_v38 = vpop.f32.mrf.mxu1 }
 0x4f4   : > { %v2850_v39 = vcombine.low %v2706_v29, %v2798_v38  ;;  %v2851_v40 = vcombine.high %v2706_v29, %v2798_v38 }
 0x4f5   : > { %v4849_v30 = vpop.f32.mrf.mxu1 }
 0x4f6   : > { %v2858_v48 = vrot.slane %v2850_v39, %v6000_v44  ;;  %v2865_v49 = vrot.slane %v2851_v40, %v6000_v44 }
 0x4f7   : > { %v2801_v41 = vpop.f32.mrf.mxu1  ;;  %v2844_v42 = vpop.f32.mrf.mxu0 }
 0x4f8   : > { %v2866_v43 = vcombine.low %v2752_v31, %v2844_v42  ;;  %v2867_v45 = vcombine.high %v2752_v31, %v2844_v42 }
 0x4f9   : > { %v4850_v46 = vpop.f32.mrf.mxu1  ;;  %v4855_v47 = vpop.f32.mrf.mxu0 }
 0x4fa   : > { %v2874_v51 = vrot.slane %v2866_v43, %v6000_v44  ;;  %v2881_v52 = vrot.slane %v2867_v45, %v6000_v44  ;;  %v1599_v43 = vadd.f32 %v5981_v23, %v5974_v20 }
 0x4fb   : > { %v2847_v53 = vpop.f32.mrf.mxu0 }
 0x4fc   : > { %v2882_v54 = vcombine.low %v2858_v48, %v2874_v51  ;;  %v2883_v55 = vcombine.high %v2858_v48, %v2874_v51  ;;  %v2898_v56 = vcombine.low %v2865_v49, %v2881_v52  ;;  %v2899_v57 = vcombine.high %v2865_v49, %v2881_v52 }
 0x4fd   : > { %v4856_v59 = vpop.f32.mrf.mxu0 }
 0x4fe   : > { %v2890_v60 = vrot.slane %v2882_v54, %v6002_v50  ;;  %v2897_v61 = vrot.slane %v2883_v55, %v6002_v50  ;;  %v2906_v62 = vrot.slane %v2898_v56, %v6002_v50  ;;  %v2913_v63 = vrot.slane %v2899_v57, %v6002_v50 }
 0x500   : > { %v2918_v1 = vcombine.low %v2890_v60, %v2897_v61  ;;  %v4626_v2 = vcombine.high %v2890_v60, %v2897_v61  ;;  %v2934_v4 = vcombine.low %v2906_v62, %v2913_v63  ;;  %v4627_v5 = vcombine.high %v2906_v62, %v2913_v63 }
 0x502   : > { %v2925_v7 = vrot.slane %v2918_v1, %v6000_v44  ;;  %v2933_v8 = vrot.slane %v4626_v2, %v6000_v44  ;;  %v2941_v9 = vrot.slane %v2934_v4, %v6000_v44  ;;  %v2949_v10 = vrot.slane %v4627_v5, %v6000_v44 }
 0x504   : > { %v2951_v12 = vcombine.high %v2925_v7, %v2933_v8  ;;  %v2967_v14 = vcombine.high %v2941_v9, %v2949_v10  ;;  %v2950_v15 = vcombine.low %v2925_v7, %v2933_v8  ;;  %v2966_v16 = vcombine.low %v2941_v9, %v2949_v10 }
 0x506   : > { %v2965_v17 = vrot.slane %v2951_v12, %v6002_v50  ;;  %v2981_v18 = vrot.slane %v2967_v14, %v6002_v50  ;;  %v2958_v11 = vrot.slane %v2950_v15, %v6002_v50  ;;  %v2974_v13 = vrot.slane %v2966_v16, %v6002_v50 }
 0x508   : > { %v2984_v19 = vcombine.low %v2965_v17, %v2981_v18  ;;  %v2983_v21 = vcombine.high %v2958_v11, %v2974_v13  ;;  %v2982_v22 = vcombine.low %v2958_v11, %v2974_v13  ;;  %v2985_v24 = vcombine.high %v2965_v17, %v2981_v18 }
 0x50a   : > { %2991 = vrot.lane.b32.xlu1 %v2984_v19, %s5616_s15  ;;  %2987 = vrot.lane.b32.xlu0 %v2983_v21, %s5617_s18 }
 0x50e   : > { %2995 = vrot.lane.b32.xlu1 %v2985_v24, %s6541_s23  ;;  %s6595_s23 = sld [smem:[#allocation43_spill]] }
 0x57c   : > { %v2992_v27 = vpop.permute.xlu1 %2991  ;;  %v2988_v29 = vpop.permute.xlu0 %2987 }
 0x57d   : > { %v2998_v31 = vsel %vm2427_vm3, %v2982_v22, %v2988_v29 }
 0x57e   : > { %v3000_v33 = vsel %vm2999_vm5, %v2998_v31, %v2992_v27 }
 0x580   : > { %v2996_v32 = vpop.permute.xlu1 %2995 }
 0x581   : > { %v3002_v34 = vsel %vm3001_vm6, %v3000_v33, %v2996_v32 }
 0x582   : > { %v3003_v35 = vpack.c.bf16 %v3002_v34, %v3002_v34 }
 0x584   : > { %4862 = vmatmul.mubr.msk.bf16.vlgmr.msra.gmra.mxu1 %vm1119_vm1, %v3003_v35  ;;  %v5151_v35 = vld [vmem:[%s6593_s1 + $0x8] sm:$0xff]  }
 0x585   : > { %4875 = vmatprep.mubr.msk.bf16.mxu1 %vm5610_vm0, %v5609_v0  ;;  %4866 = vmatpush3.bf16.msra.mxu0 %v5151_v35 }
 0x586   : > { %4867 = vmatprep.subr.bf16.mxu0 %v5609_v0 }
 0x644   : > { %v3064_v37 = vpop.f32.mrf.mxu1 }
 0x645   : > { %v3065_v38 = vadd.f32 %v4628_v36, %v3064_v37  ;;  %v5152_v36 = vld [vmem:[%s6593_s1] sm:$0xff]   ;;  %s5619_s1 = smov [#allocation21]  }
 0x646   : > { %v4863_v30 = vpop.f32.mrf.mxu1  ;;  %4868 = vmatpush3.bf16.msra.mxu0 %v5152_v36 }
 0x647   : > { %v3070_v39 = vadd.f32 %v3065_v38, %v5945_v3  ;;  %4879 = vmatprep.subr.bf16.mxu0 %v5609_v0 }
 0x648   : > { %v3067_v40 = vpop.f32.mrf.mxu1 }
 0x649   : > { %v3073_v41 = vsel %vm1119_vm1, %v3070_v39, 0.0 }
 0x64a   : > { %3074 = vadd.xlane.f32.xlu0 %v3073_v41  ;;  %v4864_v42 = vpop.f32.mrf.mxu1 }
 0x660   : > { %1671 = vrot.lane.b32.xlu0 %v1599_v43, %s5612_s11 }
 0x664   : > { %1677 = vrot.lane.b32.xlu0 %v1599_v43, %s5613_s8 }
 0x668   : > { %1683 = vrot.lane.b32.xlu0 %v1599_v43, %s5611_s10 }
 0x6d3   : > { %v3075_v45 = vpop.xlane.xlu0 %3074 }
 0x6d4   : > { %v3077_v46 = vmul.f32 0.03125, %v3075_v45 }
 0x6d6   : > { %v6185_v47 = vsub.f32 %v3070_v39, %v3077_v46 }
 0x6d7   : > { %v1672_v48 = vpop.permute.xlu0 %1671 }
 0x6d8   : > { %v3079_v3 = vmul.f32 %v6185_v47, %v6185_v47 }
 0x6da   : > { %v3080_v49 = vsel %vm1119_vm1, %v3079_v3, 0.0 }
 0x6db   : > { %3081 = vadd.xlane.f32.xlu1 %v3080_v49  ;;  %v1678_v51 = vpop.permute.xlu0 %1677 }
 0x6dc   : > { %v1689_v52 = vcombine.low %v1599_v43, %v1678_v51  ;;  %v1690_v20 = vcombine.high %v1599_v43, %v1678_v51  ;;  %v4632_v51 = vld [vmem:[%s6594_s2] ss:$0 sm:$0xff]  ;;  %s6602_s2 = sld [smem:[#allocation39_spill]] }
 0x6de   : > { %v1697_v55 = vrot.slane %v1689_v52, %v6000_v44  ;;  %v1704_v56 = vrot.slane %v1690_v20, %v6000_v44 }
 0x6df   : > { %v1684_v23 = vpop.permute.xlu0 %1683 }
 0x6e0   : > { %v1705_v53 = vcombine.low %v1672_v48, %v1684_v23  ;;  %v1706_v54 = vcombine.high %v1672_v48, %v1684_v23 }
 0x6e2   : > { %v1713_v57 = vrot.slane %v1705_v53, %v6000_v44  ;;  %v1720_v58 = vrot.slane %v1706_v54, %v6000_v44  ;;  %v4633_v53 = vld [vmem:[%s6595_s23] ss:$0 sm:$0xff]  ;;  %s6596_s23 = sld [smem:[#allocation37_spill]] }
 0x6e4   : > { %v1721_v59 = vcombine.low %v1697_v55, %v1713_v57  ;;  %v1722_v60 = vcombine.high %v1697_v55, %v1713_v57  ;;  %v1737_v61 = vcombine.low %v1704_v56, %v1720_v58  ;;  %v1738_v62 = vcombine.high %v1704_v56, %v1720_v58 }
 0x6e6   : > { %v1729_v63 = vrot.slane %v1721_v59, %v6002_v50  ;;  %v1736_v1 = vrot.slane %v1722_v60, %v6002_v50  ;;  %v1745_v2 = vrot.slane %v1737_v61, %v6002_v50  ;;  %v1752_v4 = vrot.slane %v1738_v62, %v6002_v50 }
 0x6e8   : > { %v1791_v5 = vcombine.low %v1729_v63, %v1736_v1  ;;  %v4590_v6 = vcombine.high %v1729_v63, %v1736_v1  ;;  %v1807_v7 = vcombine.low %v1745_v2, %v1752_v4  ;;  %v4591_v8 = vcombine.high %v1745_v2, %v1752_v4 }
 0x6ea   : > { %v1798_v9 = vrot.slane %v1791_v5, %v6000_v44  ;;  %v1806_v10 = vrot.slane %v4590_v6, %v6000_v44  ;;  %v1814_v12 = vrot.slane %v1807_v7, %v6000_v44  ;;  %v1822_v14 = vrot.slane %v4591_v8, %v6000_v44 }
 0x6ec   : > { %v1823_v15 = vcombine.low %v1798_v9, %v1806_v10  ;;  %v1824_v16 = vcombine.high %v1798_v9, %v1806_v10  ;;  %v1839_v17 = vcombine.low %v1814_v12, %v1822_v14  ;;  %v1840_v18 = vcombine.high %v1814_v12, %v1822_v14  ;;  %1673 = vrot.lane.b32.xlu1 %v5985_v26, %s5612_s11  ;;  %v4634_v12 = vld [vmem:[#allocation12] ss:$0 sm:$0xff] }
 0x6ee   : > { %v1831_v11 = vrot.slane %v1823_v15, %v6002_v50  ;;  %v1838_v13 = vrot.slane %v1824_v16, %v6002_v50  ;;  %v1847_v19 = vrot.slane %v1839_v17, %v6002_v50  ;;  %v1854_v21 = vrot.slane %v1840_v18, %v6002_v50 }
 0x6f0   : > { %v1855_v22 = vcombine.low %v1831_v11, %v1847_v19  ;;  %v1856_v24 = vcombine.high %v1831_v11, %v1847_v19  ;;  %v1857_v27 = vcombine.low %v1838_v13, %v1854_v21  ;;  %v1858_v29 = vcombine.high %v1838_v13, %v1854_v21  ;;  %1679 = vrot.lane.b32.xlu1 %v5985_v26, %s5613_s8 }
 0x6f2   : > { %v4687_v31 = vpack.c.bf16 %v1855_v22, %v1855_v22  ;;  %v4689_v32 = vpack.c.bf16 %v1856_v24, %v1856_v24  ;;  %v4691_v33 = vpack.c.bf16 %v1857_v27, %v1857_v27  ;;  %v4693_v34 = vpack.c.bf16 %v1858_v29, %v1858_v29 }
 0x6f4   : > { %1925 = vst.msk [vmem:[#allocation4] sm:$0xf] %vm1376_vm2, %v4687_v31  ;;  %1928 = vst.msk [vmem:[#allocation4 + $0x8] sm:$0xf] %vm1376_vm2, %v4689_v32  ;;  %1685 = vrot.lane.b32.xlu1 %v5985_v26, %s5611_s10 }
 0x6f5   : > { %1930 = vst.msk [vmem:[#allocation4 + $0x10] sm:$0xf] %vm1376_vm2, %v4691_v33  ;;  %1932 = vst.msk [vmem:[#allocation4 + $0x18] sm:$0xf] %vm1376_vm2, %v4693_v34 }
 0x764   : > { %v3082_v37 = vpop.xlane.xlu1 %3081 }
 0x765   : > { %v3083_v38 = vmul.f32 0.03125, %v3082_v37 }
 0x767   : > { %v3084_v30 = vadd.f32 1e-06, %v3083_v38 }
 0x768   : > { %v1674_v39 = vpop.permute.xlu1 %1673 }
 0x769   : > { %5185 = vrsqrt.f32 %v3084_v30 }
 0x76c   : > { %v1680_v40 = vpop.permute.xlu1 %1679 }
 0x76d   : > { %v1757_v41 = vcombine.low %v5985_v26, %v1680_v40 }
 0x76f   : > { %v1764_v45 = vrot.slane %v1757_v41, %v6000_v44 }
 0x770   : > { %v1686_v42 = vpop.permute.xlu1 %1685 }
 0x771   : > { %v1765_v43 = vcombine.low %v1674_v39, %v1686_v42 }
 0x773   : > { %v1772_v46 = vrot.slane %v1765_v43, %v6000_v44 }
 0x775   : > { %v1773_v48 = vcombine.low %v1764_v45, %v1772_v46  ;;  %v1774_v3 = vcombine.high %v1764_v45, %v1772_v46 }
 0x776   : > { %v5186_v49 = vpop.eup %5185 }
 0x777   : > { %v3086_v52 = vmul.f32 %v5186_v49, %v6185_v47  ;;  %v1781_v20 = vrot.slane %v1773_v48, %v6002_v50  ;;  %v1788_v23 = vrot.slane %v1774_v3, %v6002_v50 }
 0x779   : > { %v1859_v54 = vcombine.low %v1781_v20, %v1788_v23  ;;  %v4592_v55 = vcombine.high %v1781_v20, %v1788_v23  ;;  %v3093_v26 = vmul.f32 %v4632_v51, %v3086_v52 }
 0x77b   : > { %v1866_v56 = vrot.slane %v1859_v54, %v6000_v44  ;;  %v1874_v57 = vrot.slane %v4592_v55, %v6000_v44  ;;  %v6230_v58 = vadd.f32 %v4633_v53, %v3093_v26 }
 0x77d   : > { %v1875_v59 = vcombine.low %v1866_v56, %v1874_v57  ;;  %v1876_v60 = vcombine.high %v1866_v56, %v1874_v57  ;;  %v3101_v61 = vpack.c.bf16 %v6230_v58, %v6230_v58 }
 0x77f   : > { %v1883_v47 = vrot.slane %v1875_v59, %v6002_v50  ;;  %v1890_v62 = vrot.slane %v1876_v60, %v6002_v50  ;;  %4870 = vmatmul.mubr.msk.bf16.vlgmr.msra.gmra.mxu0 %vm1119_vm1, %v3101_v61 }
 0x780   : > { %4881 = vmatprep.mubr.msk.bf16.mxu0 %vm5610_vm0, %v5609_v0 }
 0x781   : > { %v1891_v63 = vcombine.high %v1883_v47, %v5609_v0  ;;  %v1892_v1 = vcombine.high %v1890_v62, %v5609_v0  ;;  %v4688_v2 = vpack.c.bf16 %v1883_v47, %v1883_v47  ;;  %v4692_v4 = vpack.c.bf16 %v1890_v62, %v1890_v62 }
 0x783   : > { %v4690_v5 = vpack.c.bf16 %v1891_v63, %v1891_v63  ;;  %v4694_v6 = vpack.c.bf16 %v1892_v1, %v1892_v1  ;;  %1927 = vst.msk [vmem:[#allocation4 + $0x4] sm:$0x3] %vm1926_vm7, %v4688_v2  ;;  %1931 = vst.msk [vmem:[#allocation4 + $0x14] sm:$0x3] %vm1926_vm7, %v4692_v4 }
 0x785   : > { %1929 = vst.msk [vmem:[#allocation4 + $0xc] sm:$0x3] %vm1926_vm7, %v4690_v5  ;;  %1933 = vst.msk [vmem:[#allocation4 + $0x1c] sm:$0x3] %vm1926_vm7, %v4694_v6 }
 0x78a   : > { %v5153_v7 = vld [vmem:[#allocation4] sm:$0x3f]   ;;  %v5155_v56 = vld [vmem:[#allocation4 + $0x10] sm:$0x3f]  }
 0x78b   : > { %v3343_v8 = vsel %vm2427_vm3, %v5153_v7, 0  ;;  %v3445_v62 = vsel %vm2427_vm3, %v5155_v56, 0 }
 0x78c   : > { %v5154_v9 = vld [vmem:[#allocation4 + $0x8] sm:$0x3f]   ;;  %4874 = vmatpush3.bf16.xpose.msra.mxu1 %v3343_v8  ;;  %v5156_v57 = vld [vmem:[#allocation4 + $0x18] sm:$0x3f]  }
 0x78d   : > { %v3394_v10 = vsel %vm2427_vm3, %v5154_v9, 0  ;;  %4885 = vmatprep.subr.bf16.mxu1 %v5609_v0  ;;  %v3496_v63 = vsel %vm2427_vm3, %v5156_v57, 0 }
 0x78e   : > { %4880 = vmatpush3.bf16.xpose.msra.mxu0 %v3394_v10 }
 0x78f   : > { %4891 = vmatprep.subr.bf16.mxu0 %v5609_v0 }
 0x83f   : > { %v3162_v14 = vpop.f32.mrf.mxu0 }
 0x840   : > { %v3163_v15 = vadd.f32 %v4634_v12, %v3162_v14 }
 0x841   : > { %v4871_v16 = vpop.f32.mrf.mxu0 }
 0x842   : > { %3172 = vrot.lane.b32.xlu1 %v3163_v15, %s5613_s8  ;;  %3169 = vrot.lane.b32.xlu0 %v3163_v15, %s5612_s11 }
 0x843   : > { %v3165_v17 = vpop.f32.mrf.mxu0 }
 0x845   : > { %v4872_v18 = vpop.f32.mrf.mxu0 }
 0x846   : > { %3175 = vrot.lane.b32.xlu0 %v3163_v15, %s5611_s10 }
 0x8b4   : > { %v3173_v11 = vpop.permute.xlu1 %3172  ;;  %v3170_v13 = vpop.permute.xlu0 %3169 }
 0x8b5   : > { %v3178_v19 = vcombine.low %v3163_v15, %v3173_v11  ;;  %v3179_v21 = vcombine.high %v3163_v15, %v3173_v11 }
 0x8b7   : > { %v3186_v29 = vrot.slane %v3178_v19, %v6000_v44  ;;  %v3193_v31 = vrot.slane %v3179_v21, %v6000_v44 }
 0x8b8   : > { %v3176_v22 = vpop.permute.xlu0 %3175 }
 0x8b9   : > { %v3194_v24 = vcombine.low %v3170_v13, %v3176_v22  ;;  %v3195_v27 = vcombine.high %v3170_v13, %v3176_v22 }
 0x8bb   : > { %v3202_v32 = vrot.slane %v3194_v24, %v6000_v44  ;;  %v3209_v33 = vrot.slane %v3195_v27, %v6000_v44 }
 0x8bd   : > { %v3210_v34 = vcombine.low %v3186_v29, %v3202_v32  ;;  %v3211_v35 = vcombine.high %v3186_v29, %v3202_v32  ;;  %v3226_v36 = vcombine.low %v3193_v31, %v3209_v33  ;;  %v3227_v37 = vcombine.high %v3193_v31, %v3209_v33  ;;  %v4586_v32 = vld [vmem:[%s6596_s23] ss:$0 sm:$0xff]  ;;  %s6603_s23 = sld [smem:[#allocation41_spill]] }
 0x8be   : > { %v1666_v33 = vadd.f32 %v4586_v32, %v6064_v28 }
 0x8bf   : > { %v3218_v38 = vrot.slane %v3210_v34, %v6002_v50  ;;  %v3225_v30 = vrot.slane %v3211_v35, %v6002_v50  ;;  %v3234_v39 = vrot.slane %v3226_v36, %v6002_v50  ;;  %v3241_v40 = vrot.slane %v3227_v37, %v6002_v50 }
 0x8c0   : > { %v1663_v34 = vadd.f32 %v4586_v32, %v6062_v25 }
 0x8c1   : > { %v3246_v41 = vcombine.low %v3218_v38, %v3225_v30  ;;  %v4638_v42 = vcombine.high %v3218_v38, %v3225_v30  ;;  %v3262_v43 = vcombine.low %v3234_v39, %v3241_v40  ;;  %v4639_v45 = vcombine.high %v3234_v39, %v3241_v40 }
 0x8c3   : > { %v3253_v46 = vrot.slane %v3246_v41, %v6000_v44  ;;  %v3261_v48 = vrot.slane %v4638_v42, %v6000_v44  ;;  %v3269_v3 = vrot.slane %v3262_v43, %v6000_v44  ;;  %v3277_v49 = vrot.slane %v4639_v45, %v6000_v44 }
 0x8c5   : > { %v3278_v51 = vcombine.low %v3253_v46, %v3261_v48  ;;  %v3294_v52 = vcombine.low %v3269_v3, %v3277_v49  ;;  %v3279_v20 = vcombine.high %v3253_v46, %v3261_v48  ;;  %v3295_v23 = vcombine.high %v3269_v3, %v3277_v49 }
 0x8c7   : > { %v3286_v53 = vrot.slane %v3278_v51, %v6002_v50  ;;  %v3302_v54 = vrot.slane %v3294_v52, %v6002_v50  ;;  %v3293_v61 = vrot.slane %v3279_v20, %v6002_v50  ;;  %v3309_v47 = vrot.slane %v3295_v23, %v6002_v50 }
 0x8c9   : > { %v3310_v55 = vcombine.low %v3286_v53, %v3302_v54  ;;  %v3311_v26 = vcombine.high %v3286_v53, %v3302_v54  ;;  %v3312_v1 = vcombine.low %v3293_v61, %v3309_v47  ;;  %v3313_v2 = vcombine.high %v3293_v61, %v3309_v47 }
 0x8cb   : > { %v3314_v59 = vpack.c.bf16 %v3310_v55, %v3310_v55  ;;  %v3315_v60 = vpack.c.bf16 %v3311_v26, %v3311_v26  ;;  %v3316_v4 = vpack.c.bf16 %v3312_v1, %v3312_v1  ;;  %v3317_v5 = vpack.c.bf16 %v3313_v2, %v3313_v2 }
 0x8cd   : > { %4876 = vmatmul.mubr.msk.bf16.vlgmr.msra.gmra.mxu1 %vm2427_vm3, %v3314_v59  ;;  %4882 = vmatmul.mubr.msk.bf16.vlgmr.msra.gmra.mxu0 %vm2427_vm3, %v3315_v60 }
 0x8ce   : > { %4886 = vmatpush3.bf16.xpose.msra.mxu1 %v3445_v62  ;;  %4892 = vmatpush3.bf16.xpose.msra.mxu0 %v3496_v63 }
 0x8cf   : > { %4887 = vmatprep.mubr.msk.bf16.mxu1 %vm5610_vm0, %v5609_v0  ;;  %4893 = vmatprep.mubr.msk.bf16.mxu0 %vm5610_vm0, %v5609_v0 }
 0x8d0   : > { %4897 = vmatprep.subr.bf16.mxu1 %v5609_v0  ;;  %4903 = vmatprep.subr.bf16.mxu0 %v5609_v0 }
 0x8d5   : > { %4888 = vmatmul.mubr.msk.bf16.vlgmr.msra.gmra.mxu1 %vm2427_vm3, %v3316_v4  ;;  %4894 = vmatmul.mubr.msk.bf16.vlgmr.msra.gmra.mxu0 %vm2427_vm3, %v3317_v5 }
 0x8d6   : > { %4899 = vmatprep.mubr.msk.bf16.mxu1 %vm5610_vm0, %v5609_v0  ;;  %4905 = vmatprep.mubr.msk.bf16.mxu0 %vm5610_vm0, %v5609_v0 }
 0x98d   : > { %v3379_v6 = vpop.f32.mrf.mxu1  ;;  %v3430_v7 = vpop.f32.mrf.mxu0 }
 0x98e   : > { %v3539_v8 = vsel %vm3538_vm8, %v3379_v6, -inf  ;;  %v3542_v9 = vsel %vm3538_vm8, %v3430_v7, -inf }
 0x98f   : > { %3540 = vmax.xlane.f32.xlu1 %v3539_v8  ;;  %v4877_v10 = vpop.f32.mrf.mxu1  ;;  %3543 = vmax.xlane.f32.xlu0 %v3542_v9  ;;  %v4883_v12 = vpop.f32.mrf.mxu0 }
 0x991   : > { %v3382_v14 = vpop.f32.mrf.mxu1  ;;  %v3433_v15 = vpop.f32.mrf.mxu0 }
 0x993   : > { %v4878_v16 = vpop.f32.mrf.mxu1  ;;  %v4884_v17 = vpop.f32.mrf.mxu0 }
 0x995   : > { %v3481_v18 = vpop.f32.mrf.mxu1  ;;  %v3532_v11 = vpop.f32.mrf.mxu0 }
 0x996   : > { %v3545_v13 = vsel %vm3538_vm8, %v3481_v18, -inf  ;;  %v3548_v19 = vsel %vm3538_vm8, %v3532_v11, -inf }
 0x997   : > { %v4889_v21 = vpop.f32.mrf.mxu1  ;;  %3546 = vmax.xlane.f32.xlu0 %v3545_v13  ;;  %3549 = vmax.xlane.f32.xlu1 %v3548_v19  ;;  %v4895_v22 = vpop.f32.mrf.mxu0 }
 0x999   : > { %v3484_v24 = vpop.f32.mrf.mxu1  ;;  %v3535_v27 = vpop.f32.mrf.mxu0 }
 0x99b   : > { %v4890_v29 = vpop.f32.mrf.mxu1  ;;  %v4896_v31 = vpop.f32.mrf.mxu0 }
 0x9a8   : > { %1938 = vrot.lane.b32.xlu1 %v1666_v33, %s5612_s11 }
 0x9ac   : > { %1942 = vrot.lane.b32.xlu1 %v1663_v34, %s5613_s8 }
 0x9ad   : > { %1936 = vrot.lane.b32.xlu0 %v1663_v34, %s5612_s11  ;;  %s6597_s11 = sld [smem:[#allocation38_spill]] }
 0x9b0   : > { %1948 = vrot.lane.b32.xlu1 %v1663_v34, %s5611_s10 }
 0x9b1   : > { %1944 = vrot.lane.b32.xlu0 %v1666_v33, %s5613_s8  ;;  %s6598_s8 = smov 24  }
 0x9b5   : > { %1950 = vrot.lane.b32.xlu0 %v1666_v33, %s5611_s10  ;;  %s6355_s10 = scalar_lea.vmem [#allocation23], %s4565_s3  ;;  %s6599_s3 = sld [smem:[#allocation40_spill]] }
 0xa18   : > { %v3541_v35 = vpop.xlane.xlu1 %3540  ;;  %v3544_v36 = vpop.xlane.xlu0 %3543 }
 0xa19   : > { %v3551_v37 = vsub.f32 %v3379_v6, %v3541_v35  ;;  %v3552_v38 = vsub.f32 %v3430_v7, %v3544_v36 }
 0xa1b   : > { %v3555_v30 = vmul.f32 1.442695, %v3551_v37  ;;  %v3557_v28 = vmul.f32 1.442695, %v3552_v38 }
 0xa1d   : > { %5187 = vpow2.f32 %v3555_v30 }
 0xa1e   : > { %5189 = vpow2.f32 %v3557_v28 }
 0xa20   : > { %v3547_v39 = vpop.xlane.xlu0 %3546  ;;  %v3550_v25 = vpop.xlane.xlu1 %3549 }
 0xa21   : > { %v3553_v40 = vsub.f32 %v3481_v18, %v3547_v39  ;;  %v3554_v41 = vsub.f32 %v3532_v11, %v3550_v25 }
 0xa23   : > { %v3559_v42 = vmul.f32 1.442695, %v3553_v40  ;;  %v3561_v43 = vmul.f32 1.442695, %v3554_v41 }
 0xa24   : > { %v1937_v45 = vpop.permute.xlu0 %1936  ;;  %v1939_v46 = vpop.permute.xlu1 %1938 }
 0xa25   : > { %5191 = vpow2.f32 %v3559_v42 }
 0xa26   : > { %5193 = vpow2.f32 %v3561_v43 }
 0xa28   : > { %v1945_v48 = vpop.permute.xlu0 %1944  ;;  %v1943_v3 = vpop.permute.xlu1 %1942 }
 0xa29   : > { %v2022_v51 = vcombine.low %v1666_v33, %v1945_v48  ;;  %v1954_v20 = vcombine.low %v1663_v34, %v1943_v3  ;;  %v1955_v53 = vcombine.high %v1663_v34, %v1943_v3 }
 0xa2a   : > { %v6297_v49 = vpop.eup %5187 }
 0xa2b   : > { %v6299_v52 = vpop.eup %5189  ;;  %v3563_v23 = vsel %vm3538_vm8, %v6297_v49, 0.0  ;;  %v2029_v60 = vrot.slane %v2022_v51, %v6000_v44  ;;  %v1962_v61 = vrot.slane %v1954_v20, %v6000_v44  ;;  %v1969_v1 = vrot.slane %v1955_v53, %v6000_v44 }
 0xa2c   : > { %v3566_v54 = vsel %vm3538_vm8, %v6299_v52, 0.0  ;;  %v1951_v55 = vpop.permute.xlu0 %1950  ;;  %3564 = vadd.xlane.f32.xlu1 %v3563_v23  ;;  %v1949_v26 = vpop.permute.xlu1 %1948 }
 0xa2d   : > { %3567 = vadd.xlane.f32.xlu0 %v3566_v54  ;;  %v2030_v56 = vcombine.low %v1939_v46, %v1951_v55  ;;  %v1970_v57 = vcombine.low %v1937_v45, %v1949_v26  ;;  %v1971_v59 = vcombine.high %v1937_v45, %v1949_v26 }
 0xa2f   : > { %v2037_v47 = vrot.slane %v2030_v56, %v6000_v44  ;;  %v1978_v62 = vrot.slane %v1970_v57, %v6000_v44  ;;  %v1985_v63 = vrot.slane %v1971_v59, %v6000_v44 }
 0xa31   : > { %v2038_v2 = vcombine.low %v2029_v60, %v2037_v47  ;;  %v2039_v4 = vcombine.high %v2029_v60, %v2037_v47  ;;  %v1986_v5 = vcombine.low %v1962_v61, %v1978_v62  ;;  %v1987_v6 = vcombine.high %v1962_v61, %v1978_v62 }
 0xa32   : > { %v6311_v7 = vpop.eup %5191  ;;  %v2002_v8 = vcombine.low %v1969_v1, %v1985_v63  ;;  %v2003_v9 = vcombine.high %v1969_v1, %v1985_v63 }
 0xa33   : > { %v6313_v10 = vpop.eup %5193  ;;  %v2046_v12 = vrot.slane %v2038_v2, %v6002_v50  ;;  %v2053_v14 = vrot.slane %v2039_v4, %v6002_v50  ;;  %v1994_v15 = vrot.slane %v1986_v5, %v6002_v50  ;;  %v2001_v16 = vrot.slane %v1987_v6, %v6002_v50 }
 0xa34   : > { %v2010_v17 = vrot.slane %v2002_v8, %v6002_v50  ;;  %v2017_v18 = vrot.slane %v2003_v9, %v6002_v50  ;;  %v3569_v11 = vsel %vm3538_vm8, %v6311_v7, 0.0  ;;  %v3572_v13 = vsel %vm3538_vm8, %v6313_v10, 0.0 }
 0xa35   : > { %v2124_v19 = vcombine.low %v2046_v12, %v2053_v14  ;;  %v4603_v21 = vcombine.high %v2046_v12, %v2053_v14  ;;  %v2056_v22 = vcombine.low %v1994_v15, %v2001_v16  ;;  %v4601_v24 = vcombine.high %v1994_v15, %v2001_v16  ;;  %3570 = vadd.xlane.f32.xlu0 %v3569_v11 }
 0xa36   : > { %v2072_v27 = vcombine.low %v2010_v17, %v2017_v18  ;;  %v4602_v29 = vcombine.high %v2010_v17, %v2017_v18  ;;  %3573 = vadd.xlane.f32.xlu1 %v3572_v13 }
 0xa37   : > { %v2131_v31 = vrot.slane %v2124_v19, %v6000_v44  ;;  %v2139_v32 = vrot.slane %v4603_v21, %v6000_v44  ;;  %v2063_v33 = vrot.slane %v2056_v22, %v6000_v44  ;;  %v2071_v34 = vrot.slane %v4601_v24, %v6000_v44 }
 0xa38   : > { %v2079_v35 = vrot.slane %v2072_v27, %v6000_v44  ;;  %v2087_v36 = vrot.slane %v4602_v29, %v6000_v44 }
 0xa39   : > { %v2140_v37 = vcombine.low %v2131_v31, %v2139_v32  ;;  %v2141_v38 = vcombine.high %v2131_v31, %v2139_v32  ;;  %v2088_v30 = vcombine.low %v2063_v33, %v2071_v34  ;;  %v2089_v28 = vcombine.high %v2063_v33, %v2071_v34 }
 0xa3a   : > { %v2104_v39 = vcombine.low %v2079_v35, %v2087_v36  ;;  %v2105_v25 = vcombine.high %v2079_v35, %v2087_v36 }
 0xa3b   : > { %v2148_v40 = vrot.slane %v2140_v37, %v6002_v50  ;;  %v2155_v41 = vrot.slane %v2141_v38, %v6002_v50  ;;  %v2096_v42 = vrot.slane %v2088_v30, %v6002_v50  ;;  %v2103_v43 = vrot.slane %v2089_v28, %v6002_v50 }
 0xa3c   : > { %v2112_v45 = vrot.slane %v2104_v39, %v6002_v50  ;;  %v2119_v46 = vrot.slane %v2105_v25, %v6002_v50 }
 0xa3d   : > { %v2156_v48 = vcombine.high %v2148_v40, %v5609_v0  ;;  %v2157_v3 = vcombine.high %v2155_v41, %v5609_v0  ;;  %v4696_v51 = vpack.c.bf16 %v2148_v40, %v2148_v40  ;;  %v4700_v20 = vpack.c.bf16 %v2155_v41, %v2155_v41 }
 0xa3e   : > { %v2120_v23 = vcombine.low %v2096_v42, %v2112_v45  ;;  %v2121_v53 = vcombine.high %v2096_v42, %v2112_v45  ;;  %v2122_v54 = vcombine.low %v2103_v43, %v2119_v46  ;;  %v2123_v55 = vcombine.high %v2103_v43, %v2119_v46 }
 0xa3f   : > { %v4698_v26 = vpack.c.bf16 %v2156_v48, %v2156_v48  ;;  %v4702_v56 = vpack.c.bf16 %v2157_v3, %v2157_v3  ;;  %2191 = vst.msk [vmem:[#allocation5 + $0x4] sm:$0x3] %vm1926_vm7, %v4696_v51  ;;  %2195 = vst.msk [vmem:[#allocation5 + $0x14] sm:$0x3] %vm1926_vm7, %v4700_v20 }
 0xa40   : > { %v4695_v57 = vpack.c.bf16 %v2120_v23, %v2120_v23  ;;  %v4697_v59 = vpack.c.bf16 %v2121_v53, %v2121_v53  ;;  %v4699_v60 = vpack.c.bf16 %v2122_v54, %v2122_v54  ;;  %v4701_v61 = vpack.c.bf16 %v2123_v55, %v2123_v55  ;;  %v5161_v53 = vld [vmem:[#allocation17 + $0x8] sm:$0xff]  }
 0xa41   : > { %2193 = vst.msk [vmem:[#allocation5 + $0xc] sm:$0x3] %vm1926_vm7, %v4698_v26  ;;  %2197 = vst.msk [vmem:[#allocation5 + $0x1c] sm:$0x3] %vm1926_vm7, %v4702_v56 }
 0xa42   : > { %2190 = vst.msk [vmem:[#allocation5] sm:$0xf] %vm1376_vm2, %v4695_v57  ;;  %2192 = vst.msk [vmem:[#allocation5 + $0x8] sm:$0xf] %vm1376_vm2, %v4697_v59 }
 0xa43   : > { %2194 = vst.msk [vmem:[#allocation5 + $0x10] sm:$0xf] %vm1376_vm2, %v4699_v60  ;;  %2196 = vst.msk [vmem:[#allocation5 + $0x18] sm:$0xf] %vm1376_vm2, %v4701_v61 }
 0xa49   : > { %v5157_v47 = vld [vmem:[#allocation5] sm:$0x3f]   ;;  %v5158_v62 = vld [vmem:[#allocation5 + $0x8] sm:$0x3f]  }
 0xa4a   : > { %v3602_v63 = vsel %vm3600_vm9, %v5157_v47, 0  ;;  %v3653_v1 = vsel %vm3600_vm9, %v5158_v62, 0  ;;  %v5159_v14 = vld [vmem:[#allocation5 + $0x10] sm:$0x3f]   ;;  %v5160_v16 = vld [vmem:[#allocation5 + $0x18] sm:$0x3f]  }
 0xa4b   : > { %4898 = vmatpush3.bf16.msra.mxu1 %v3602_v63  ;;  %4904 = vmatpush3.bf16.msra.mxu0 %v3653_v1  ;;  %v3704_v11 = vsel %vm3600_vm9, %v5159_v14, 0  ;;  %v5162_v62 = vld [vmem:[#allocation17] sm:$0xff]  }
 0xa4c   : > { %4909 = vmatprep.subr.bf16.mxu1 %v5609_v0  ;;  %4915 = vmatprep.subr.bf16.mxu0 %v5609_v0 }
 0xab5   : > { %v3565_v2 = vpop.xlane.xlu1 %3564 }
 0xab6   : > { %v3568_v4 = vpop.xlane.xlu0 %3567  ;;  %5195 = vrcp.f32 %v3565_v2 }
 0xab7   : > { %5197 = vrcp.f32 %v3568_v4 }
 0xabe   : > { %v3571_v5 = vpop.xlane.xlu0 %3570 }
 0xabf   : > { %5199 = vrcp.f32 %v3571_v5  ;;  %v3574_v6 = vpop.xlane.xlu1 %3573 }
 0xac0   : > { %5201 = vrcp.f32 %v3574_v6 }
 0xac3   : > { %v5196_v8 = vpop.eup %5195 }
 0xac4   : > { %v5198_v9 = vpop.eup %5197  ;;  %v3579_v12 = vmul.f32 %v5196_v8, %v6297_v49  ;;  %v3755_v49 = vsel %vm3600_vm9, %v5160_v16, 0 }
 0xac5   : > { %v3580_v15 = vmul.f32 %v5198_v9, %v6299_v52 }
 0xac6   : > { %v3583_v17 = vpack.c.bf16 %v3579_v12, %v3579_v12 }
 0xac7   : > { %v3584_v18 = vpack.c.bf16 %v3580_v15, %v3580_v15 }
 0xac8   : > { %3588 = vst.msk [vmem:[%s6355_s10] sm:$0xf] %vm3587_vm10, %v3583_v17  ;;  %4900 = vmatmul.mubr.msk.bf16.vlgmr.msra.gmra.mxu1 %vm3538_vm8, %v3583_v17 }
 0xac9   : > { %3589 = vst.msk [vmem:[%s6355_s10 + $0x4] sm:$0xf] %vm3587_vm10, %v3584_v18  ;;  %4906 = vmatmul.mubr.msk.bf16.vlgmr.msra.gmra.mxu0 %vm3538_vm8, %v3584_v18  ;;  %4910 = vmatpush3.bf16.msra.mxu1 %v3704_v11 }
 0xaca   : > { %4916 = vmatpush3.bf16.msra.mxu0 %v3755_v49  ;;  %4911 = vmatprep.mubr.msk.bf16.mxu1 %vm5610_vm0, %v5609_v0 }
 0xacb   : > { %4917 = vmatprep.mubr.msk.bf16.mxu0 %vm5610_vm0, %v5609_v0  ;;  %4921 = vmatprep.subr.bf16.mxu1 %v5609_v0 }
 0xacc   : > { %v5200_v52 = vpop.eup %5199  ;;  %4929 = vmatprep.subr.bf16.mxu0 %v5609_v0 }
 0xacd   : > { %v5202_v13 = vpop.eup %5201  ;;  %v3581_v19 = vmul.f32 %v5200_v52, %v6311_v7 }
 0xace   : > { %v3582_v21 = vmul.f32 %v5202_v13, %v6313_v10 }
 0xacf   : > { %v3585_v22 = vpack.c.bf16 %v3581_v19, %v3581_v19 }
 0xad0   : > { %v3586_v24 = vpack.c.bf16 %v3582_v21, %v3582_v21 }
 0xad1   : > { %3590 = vst.msk [vmem:[%s6355_s10 + $0x8] sm:$0xf] %vm3587_vm10, %v3585_v22  ;;  %4912 = vmatmul.mubr.msk.bf16.vlgmr.msra.gmra.mxu1 %vm3538_vm8, %v3585_v22 }
 0xad2   : > { %3591 = vst.msk [vmem:[%s6355_s10 + $0xc] sm:$0xf] %vm3587_vm10, %v3586_v24  ;;  %4918 = vmatmul.mubr.msk.bf16.vlgmr.msra.gmra.mxu0 %vm3538_vm8, %v3586_v24  ;;  %4925 = vmatprep.mubr.msk.bf16.mxu1 %vm5610_vm0, %v5609_v0  ;;  %v4658_v24 = vld [vmem:[%s6597_s11] ss:$0 sm:$0xff]  ;;  %s4233_s11 = sand.u32 1, %s5815_s26  }
 0xad3   : > { %4933 = vmatprep.mubr.msk.bf16.mxu0 %vm5610_vm0, %v5609_v0  ;;  %4922 = vmatpush3.bf16.msra.mxu1 %v5161_v53  ;;  %v4664_v53 = vld [vmem:[%s6602_s2] ss:$0 sm:$0xff]  ;;  %s6443_s2 = scalar_lea.sflag [#allocation22], %s4233_s11 }
 0xad4   : > { %4923 = vmatprep.subr.bf16.mxu1 %v5609_v0 }
 0xad7   : > { %4924 = vmatpush3.bf16.msra.mxu1 %v5162_v62 }
 0xad8   : > { %4937 = vmatprep.subr.bf16.mxu1 %v5609_v0 }
 0xb88   : > { %v3638_v27 = vpop.f32.mrf.mxu1 }
 0xb89   : > { %v3689_v7 = vpop.f32.mrf.mxu0 }
 0xb8a   : > { %v4901_v29 = vpop.f32.mrf.mxu1 }
 0xb8b   : > { %v4907_v10 = vpop.f32.mrf.mxu0 }
 0xb8c   : > { %v3641_v31 = vpop.f32.mrf.mxu1 }
 0xb8d   : > { %v3692_v32 = vpop.f32.mrf.mxu0 }
 0xb8e   : > { %v4902_v33 = vpop.f32.mrf.mxu1 }
 0xb8f   : > { %v4908_v34 = vpop.f32.mrf.mxu0 }
 0xb91   : > { %v3740_v35 = vpop.f32.mrf.mxu1 }
 0xb92   : > { %v3797_v36 = vcombine.low %v3638_v27, %v3740_v35  ;;  %v3798_v37 = vcombine.high %v3638_v27, %v3740_v35  ;;  %v3791_v38 = vpop.f32.mrf.mxu0 }
 0xb93   : > { %v3813_v30 = vcombine.low %v3689_v7, %v3791_v38  ;;  %v3814_v28 = vcombine.high %v3689_v7, %v3791_v38  ;;  %v4913_v39 = vpop.f32.mrf.mxu1 }
 0xb94   : > { %v3805_v25 = vrot.slane %v3797_v36, %v6000_v44  ;;  %v3812_v40 = vrot.slane %v3798_v37, %v6000_v44  ;;  %v4919_v41 = vpop.f32.mrf.mxu0  ;;  %v5166_v39 = vld [vmem:[%s6599_s3 + $0x10] sm:$0xff]  }
 0xb95   : > { %v3821_v42 = vrot.slane %v3813_v30, %v6000_v44  ;;  %v3828_v43 = vrot.slane %v3814_v28, %v6000_v44  ;;  %v3743_v45 = vpop.f32.mrf.mxu1  ;;  %v5163_v30 = vld [vmem:[#allocation18 + $0x8] sm:$0xff]   ;;  %v5164_v28 = vld [vmem:[#allocation18] sm:$0xff]  }
 0xb96   : > { %v3794_v46 = vpop.f32.mrf.mxu0  ;;  %4930 = vmatpush3.bf16.msra.mxu0 %v5163_v30 }
 0xb97   : > { %v3829_v48 = vcombine.low %v3805_v25, %v3821_v42  ;;  %v3830_v3 = vcombine.high %v3805_v25, %v3821_v42  ;;  %v3845_v51 = vcombine.low %v3812_v40, %v3828_v43  ;;  %v3846_v20 = vcombine.high %v3812_v40, %v3828_v43  ;;  %v4914_v23 = vpop.f32.mrf.mxu1  ;;  %4931 = vmatprep.subr.bf16.mxu0 %v5609_v0 }
 0xb98   : > { %v4920_v54 = vpop.f32.mrf.mxu0  ;;  %v5168_v23 = vld [vmem:[%s6599_s3] sm:$0xff]  }
 0xb99   : > { %v3837_v55 = vrot.slane %v3829_v48, %v6002_v50  ;;  %v3844_v26 = vrot.slane %v3830_v3, %v6002_v50  ;;  %v3853_v56 = vrot.slane %v3845_v51, %v6002_v50  ;;  %v3860_v57 = vrot.slane %v3846_v20, %v6002_v50  ;;  %v5167_v20 = vld [vmem:[%s6599_s3 + $0x8] sm:$0xff]  }
 0xb9a   : > { %4932 = vmatpush3.bf16.msra.mxu0 %v5164_v28 }
 0xb9b   : > { %v3865_v59 = vcombine.low %v3837_v55, %v3844_v26  ;;  %v4656_v60 = vcombine.high %v3837_v55, %v3844_v26  ;;  %v3881_v61 = vcombine.low %v3853_v56, %v3860_v57  ;;  %v4657_v47 = vcombine.high %v3853_v56, %v3860_v57 }
 0xb9d   : > { %v3872_v63 = vrot.slane %v3865_v59, %v6000_v44  ;;  %v3880_v1 = vrot.slane %v4656_v60, %v6000_v44  ;;  %v3888_v2 = vrot.slane %v3881_v61, %v6000_v44  ;;  %v3896_v4 = vrot.slane %v4657_v47, %v6000_v44  ;;  %v4668_v61 = vld [vmem:[%s6603_s23] ss:$0 sm:$0xff] }
 0xb9f   : > { %v3898_v5 = vcombine.high %v3872_v63, %v3880_v1  ;;  %v3914_v6 = vcombine.high %v3888_v2, %v3896_v4  ;;  %v3897_v8 = vcombine.low %v3872_v63, %v3880_v1  ;;  %v3913_v9 = vcombine.low %v3888_v2, %v3896_v4 }
 0xba1   : > { %v3912_v12 = vrot.slane %v3898_v5, %v6002_v50  ;;  %v3928_v14 = vrot.slane %v3914_v6, %v6002_v50  ;;  %v3905_v15 = vrot.slane %v3897_v8, %v6002_v50  ;;  %v3921_v16 = vrot.slane %v3913_v9, %v6002_v50 }
 0xba3   : > { %v3931_v17 = vcombine.low %v3912_v12, %v3928_v14  ;;  %v3930_v18 = vcombine.high %v3905_v15, %v3921_v16  ;;  %v3929_v11 = vcombine.low %v3905_v15, %v3921_v16  ;;  %v3932_v44 = vcombine.high %v3912_v12, %v3928_v14 }
 0xba5   : > { %3938 = vrot.lane.b32.xlu1 %v3931_v17, %s5616_s15  ;;  %3934 = vrot.lane.b32.xlu0 %v3930_v18, %s5617_s18  ;;  %s6600_s15 = sld [smem:[#allocation44_spill]] }
 0xba6   : > { %s6601_s18 = sld [smem:[#allocation45_spill]] }
 0xba9   : > { %3942 = vrot.lane.b32.xlu1 %v3932_v44, %s6598_s8  ;;  %s4703_s8 = sshll.u32 %s5559_s22, 8 }
 0xbab   : > { %v4662_v43 = vld [vmem:[%s6600_s15] ss:$0 sm:$0xff]  ;;  %s6438_s15 = scalar_lea.hbm %s6565_s4, %s4703_s8 }
 0xbac   : > { %v4663_v46 = vld [vmem:[%s6601_s18] ss:$0 sm:$0xff]  ;;  %s4267_s18 = sshll.u32 %s6121_s20, 4  ;;  %s6441_s18 = int_to_ptr.vmem [resolvable:$true] %s4267_s18 }
 0xbad   : > { %s5415_s23 = scalar_lea.vmem %s6441_s18, 256 }
 0xbae   : > { %p5416_p11 = scmp.ne.s32.totalorder %s6441_s18, %s5415_s23 }
 0xbb0   : > { %p5417_p12 = pnand %p5416_p11, %p6604_p9 }
 0xbb2   : > { %p5418_p4 = pneg %p5417_p12 }
 0xc17   : > { %v3939_v49 = vpop.permute.xlu1 %3938  ;;  %v3935_v52 = vpop.permute.xlu0 %3934 }
 0xc18   : > { %v3945_v13 = vsel %vm2427_vm3, %v3929_v11, %v3935_v52 }
 0xc19   : > { %v3946_v21 = vsel %vm2999_vm5, %v3945_v13, %v3939_v49 }
 0xc1b   : > { %v3943_v19 = vpop.permute.xlu1 %3942 }
 0xc1c   : > { %v3947_v50 = vsel %vm3001_vm6, %v3946_v21, %v3943_v19 }
 0xc1d   : > { %v3948_v22 = vpack.c.bf16 %v3947_v50, %v3947_v50 }
 0xc1f   : > { %4926 = vmatmul.mubr.msk.bf16.vlgmr.msra.gmra.mxu1 %vm1119_vm1, %v3948_v22 }
 0xc20   : > { %4945 = vmatprep.mubr.msk.bf16.mxu1 %vm5610_vm0, %v5609_v0 }
 0xcdf   : > { %v4009_v27 = vpop.f32.mrf.mxu1 }
 0xce0   : > { %v4010_v7 = vadd.f32 %v4658_v24, %v4009_v27 }
 0xce1   : > { %v4927_v29 = vpop.f32.mrf.mxu1 }
 0xce2   : > { %v4015_v10 = vadd.f32 %v4010_v7, %v6230_v58  ;;  %v5165_v58 = vld [vmem:[%s6599_s3 + $0x18] sm:$0xff]   ;;  %s5419_s3 = sshll.u32 %s5619_s1, 4  ;;  %s5420_s3 = int_to_ptr.vmem [resolvable:$false] %s5419_s3 }
 0xce3   : > { %v4012_v31 = vpop.f32.mrf.mxu1  ;;  %4938 = vmatpush3.bf16.msra.mxu1 %v5165_v58  ;;  %s5421_s26 = scalar_lea.vmem %s5420_s3, 512  ;;  %p5422_p0 = scmp.lt.s32.totalorder %s6441_s18, %s5420_s3 }
 0xce4   : > { %v4018_v32 = vsel %vm1119_vm1, %v4015_v10, 0.0  ;;  %4939 = vmatprep.subr.bf16.mxu1 %v5609_v0  ;;  %p5423_p8 = scmp.lt.s32.totalorder %s5421_s26, %s5415_s23 }
 0xce5   : > { %4019 = vadd.xlane.f32.xlu0 %v4018_v32  ;;  %v4928_v33 = vpop.f32.mrf.mxu1 }
 0xce6   : > { %p5424_p10 = por %p5423_p8, %p5422_p0 }
 0xce7   : > { %4940 = vmatpush3.bf16.msra.mxu1 %v5166_v39 }
 0xce8   : > { %4941 = vmatprep.subr.bf16.mxu1 %v5609_v0  ;;  %p5425_p1 = pnand %p5424_p10, %p5418_p4 }
 0xceb   : > { %4942 = vmatpush3.bf16.msra.mxu1 %v5167_v20 }
 0xcec   : > { %4943 = vmatprep.subr.bf16.mxu1 %v5609_v0 }
 0xcef   : > { %4944 = vmatpush3.bf16.msra.mxu1 %v5168_v23 }
 0xd6e   : > { %v4020_v34 = vpop.xlane.xlu0 %4019 }
 0xd6f   : > { %v4021_v35 = vmul.f32 0.03125, %v4020_v34 }
 0xd71   : > { %v4022_v36 = vsub.f32 %v4015_v10, %v4021_v35 }
 0xd73   : > { %v4023_v37 = vmul.f32 %v4022_v36, %v4022_v36 }
 0xd75   : > { %v4024_v38 = vsel %vm1119_vm1, %v4023_v37, 0.0 }
 0xd76   : > { %4025 = vadd.xlane.f32.xlu1 %v4024_v38 }
 0xdff   : > { %v4026_v25 = vpop.xlane.xlu1 %4025 }
 0xe00   : > { %v4027_v40 = vmul.f32 0.03125, %v4026_v25 }
 0xe02   : > { %v4028_v41 = vadd.f32 1e-06, %v4027_v40 }
 0xe04   : > { %5203 = vrsqrt.f32 %v4028_v41 }
 0xe11   : > { %v5204_v42 = vpop.eup %5203 }
 0xe12   : > { %v4030_v45 = vmul.f32 %v5204_v42, %v4022_v36 }
 0xe14   : > { %v4037_v48 = vmul.f32 %v4662_v43, %v4030_v45 }
 0xe16   : > { %v4044_v3 = vadd.f32 %v4663_v46, %v4037_v48 }
 0xe18   : > { %v4045_v51 = vpack.c.bf16 %v4044_v3, %v4044_v3 }
 0xe1a   : > { %4934 = vmatmul.mubr.msk.bf16.vlgmr.msra.gmra.mxu0 %vm1119_vm1, %v4045_v51 }
 0xeda   : > { %v4106_v54 = vpop.f32.mrf.mxu0 }
 0xedb   : > { %v4107_v55 = vadd.f32 %v4664_v53, %v4106_v54 }
 0xedc   : > { %v4935_v26 = vpop.f32.mrf.mxu0 }
 0xedd   : > { %v4112_v56 = vmax.f32 %v4107_v55, 0.0 }
 0xede   : > { %v4109_v57 = vpop.f32.mrf.mxu0 }
 0xedf   : > { %v4113_v59 = vpack.c.bf16 %v4112_v56, %v4112_v56 }
 0xee0   : > { %v4936_v60 = vpop.f32.mrf.mxu0 }
 0xee1   : > { %4946 = vmatmul.mubr.msk.bf16.vlgmr.msra.gmra.mxu1 %vm4153_vm11, %v4113_v59 }
 0xfa1   : > { %v4191_v47 = vpop.f32.mrf.mxu1 }
 0xfa2   : > { %v4192_v62 = vadd.f32 %v4668_v61, %v4191_v47 }
 0xfa3   : > { %v4947_v0 = vpop.f32.mrf.mxu1 }
 0xfa4   : > { %v4197_v63 = vadd.f32 %v4192_v62, %v4044_v3 }
 0xfa5   : > { %v4194_v1 = vpop.f32.mrf.mxu1 }
 0xfa6   : > { %v4200_v2 = vsel %vm1119_vm1, %v4197_v63, 0.0 }
 0xfa7   : > { %4201 = vadd.xlane.f32.xlu0 %v4200_v2  ;;  %v4948_v4 = vpop.f32.mrf.mxu1 }
0x1030   : > { %v4202_v5 = vpop.xlane.xlu0 %4201 }
0x1031   : > { %v4203_v6 = vmul.f32 0.03125, %v4202_v5 }
0x1033   : > { %v6428_v8 = vsub.f32 %v4197_v63, %v4203_v6 }
0x1035   : > { %v4205_v9 = vmul.f32 %v6428_v8, %v6428_v8 }
0x1037   : > { %v4206_v12 = vsel %vm1119_vm1, %v4205_v9, 0.0 }
0x1038   : > { %4207 = vadd.xlane.f32.xlu0 %v4206_v12 }
0x1039   : > { %5428 = shalt.err (!%p5425_p1)
}
0x103a   : > { %s5429_s20 = scalar_lea.hbm %s6438_s15, 256  ;;  %s5433_s11 = scalar_lea.hbm %s6565_s4, 512 }
0x103b   : > { %p5430_p13 = scmp.ne.s32.totalorder %s6438_s15, %s5429_s20  ;;  %p5434_p5 = scmp.lt.s32.totalorder %s6438_s15, %s6565_s4 }
0x103c   : > { %p5435_p6 = scmp.lt.s32.totalorder %s5433_s11, %s5429_s20 }
0x103d   : > { %p5431_p2 = pnand %p5430_p13, %p6604_p9 }
0x103e   : > { %p5436_p7 = por %p5435_p6, %p5434_p5 }
0x103f   : > { %p5432_p3 = pneg %p5431_p2 }
0x1041   : > { %p5437_p11 = pnand %p5436_p7, %p5432_p3 }
0x1043   : > { %5440 = shalt.err (!%p5437_p11)
}
0x1044   : > { %s5620_s1 = smov 64   ;;  %s5621_s3 = smov 4  }
0x1045   : > { %4982 = dma.vmem_to_hbm [thread:$0]  (%p6604_p9), %s6441_s18, 256, %s6438_s15, %s6443_s2, %s5620_s1, %s5620_s1, %s5621_s3  }
0x1046   : > { %s6468_s23 = scalar_lea.hbm %s5782_s17, %s4703_s8  ;;  %s4284_s26 = sshll.u32 %s6355_s10, 4  ;;  %s4285_s26 = int_to_ptr.vmem [resolvable:$true] %s4284_s26 }
0x1047   : > { %s5441_s20 = scalar_lea.vmem %s4285_s26, 256  ;;  %s5622_s11 = smov [#allocation23]  }
0x1048   : > { %p5442_p12 = scmp.ne.s32.totalorder %s4285_s26, %s5441_s20  ;;  %s5445_s4 = sshll.u32 %s5622_s11, 4  ;;  %s5446_s4 = int_to_ptr.vmem [resolvable:$false] %s5445_s4 }
0x1049   : > { %s5447_s5 = scalar_lea.vmem %s5446_s4, 512  ;;  %p5448_p8 = scmp.lt.s32.totalorder %s4285_s26, %s5446_s4 }
0x104a   : > { %p5443_p4 = pnand %p5442_p12, %p6604_p9  ;;  %p5449_p10 = scmp.lt.s32.totalorder %s5447_s5, %s5441_s20 }
0x104c   : > { %p5444_p0 = pneg %p5443_p4  ;;  %p5450_p1 = por %p5449_p10, %p5448_p8 }
0x104e   : > { %p5451_p13 = pnand %p5450_p1, %p5444_p0 }
0x1050   : > { %5454 = shalt.err (!%p5451_p13)
}
0x1051   : > { %s5455_s10 = scalar_lea.hbm %s6468_s23, 256  ;;  %s5459_s8 = scalar_lea.hbm %s5782_s17, 512 }
0x1052   : > { %p5456_p2 = scmp.ne.s32.totalorder %s6468_s23, %s5455_s10  ;;  %p5460_p6 = scmp.lt.s32.totalorder %s6468_s23, %s5782_s17 }
0x1053   : > { %p5461_p7 = scmp.lt.s32.totalorder %s5459_s8, %s5455_s10 }
0x1054   : > { %p5457_p3 = pnand %p5456_p2, %p6604_p9 }
0x1055   : > { %p5462_p11 = por %p5461_p7, %p5460_p6 }
0x1056   : > { %p5458_p5 = pneg %p5457_p3 }
0x1058   : > { %p5463_p12 = pnand %p5462_p11, %p5458_p5 }
0x105a   : > { %5466 = shalt.err (!%p5463_p12)
}
0x105b   : > { %s6605_s5 = sld [smem:[#allocation46_spill]]  ;;  %s4564_s18 = sshll.u32 %s6114_s28, 3 }
0x105c   : > { %s6606_s4 = sld [smem:[#allocation47_spill]]  ;;  %s4679_s11 = sshll.u32 %s5559_s22, 7 }
0x105d   : > { %s6607_s15 = sld [smem:[#allocation48_spill]]  ;;  %s1065_s10 = scalar_lea.vmem [#allocation20], %s4564_s18 }
0x105e   : > { %4983 = dma.vmem_to_hbm [thread:$0]  (%p6604_p9), %s4285_s26, 256, %s6468_s23, %s6443_s2, %s5620_s1, %s5620_s1, %s5621_s3  }
0x105f   : > { %s4253_s8 = sshll.u32 %s1065_s10, 4  ;;  %s4229_s2 = scalar_lea.sflag [#allocation8], %s6114_s28  ;;  %s4254_s8 = int_to_ptr.vmem [resolvable:$true] %s4253_s8 }
0x1060   : > { %s5467_s1 = scalar_lea.vmem %s4254_s8, 128  ;;  %s5623_s3 = smov [#allocation20]  }
0x1061   : > { %v4674_v18 = vld [vmem:[%s6605_s5] ss:$0 sm:$0xff]  ;;  %p5468_p4 = scmp.ne.s32.totalorder %s4254_s8, %s5467_s1  ;;  %s5471_s23 = sshll.u32 %s5623_s3, 4  ;;  %s5472_s23 = int_to_ptr.vmem [resolvable:$false] %s5471_s23 }
0x1062   : > { %v4675_v44 = vld [vmem:[%s6606_s4] ss:$0 sm:$0xff]  ;;  %s5473_s26 = scalar_lea.vmem %s5472_s23, 256  ;;  %p5474_p10 = scmp.lt.s32.totalorder %s4254_s8, %s5472_s23 }
0x1063   : > { %s6608_s20 = smov %s6607_s15  ;;  %s4251_s6 = scalar_lea.hbm %s6607_s15, %s4679_s11 }
0x1064   : > { %p5469_p0 = pnand %p5468_p4, %p6604_p9  ;;  %p5475_p1 = scmp.lt.s32.totalorder %s5473_s26, %s5467_s1 }
0x1066   : > { %p5470_p8 = pneg %p5469_p0  ;;  %p5476_p13 = por %p5475_p1, %p5474_p10 }
0x1068   : > { %p5477_p2 = pnand %p5476_p13, %p5470_p8 }
0x10c1   : > { %v4208_v14 = vpop.xlane.xlu0 %4207 }
0x10c2   : > { %v4209_v15 = vmul.f32 0.03125, %v4208_v14 }
0x10c4   : > { %v4210_v16 = vadd.f32 1e-06, %v4209_v15 }
0x10c6   : > { %5205 = vrsqrt.f32 %v4210_v16 }
0x10d3   : > { %v5206_v17 = vpop.eup %5205 }
0x10d4   : > { %v4212_v11 = vmul.f32 %v5206_v17, %v6428_v8 }
0x10d6   : > { %v4219_v49 = vmul.f32 %v4674_v18, %v4212_v11 }
0x10d8   : > { %v4226_v52 = vadd.f32 %v4675_v44, %v4219_v49 }
0x10da   : > { %4227 = vst.msk [vmem:[%s1065_s10] sm:$0xff] %vm1119_vm1, %v4226_v52 }
0x10db   : > { %5480 = shalt.err (!%p5477_p2)
}
0x10dc   : > { %s5481_s22 = scalar_lea.hbm %s4251_s6, 128  ;;  %s5485_s28 = scalar_lea.hbm %s6608_s20, 256 }
0x10dd   : > { %p5482_p3 = scmp.ne.s32.totalorder %s4251_s6, %s5481_s22  ;;  %p5486_p7 = scmp.lt.s32.totalorder %s4251_s6, %s6608_s20 }
0x10de   : > { %p5487_p11 = scmp.lt.s32.totalorder %s5485_s28, %s5481_s22 }
0x10df   : > { %p5483_p5 = pnand %p5482_p3, %p6604_p9 }
0x10e0   : > { %p5488_p12 = por %p5487_p11, %p5486_p7 }
0x10e1   : > { %p5484_p6 = pneg %p5483_p5 }
0x10e3   : > { %p5489_p4 = pnand %p5488_p12, %p5484_p6 }
0x10e5   : > { %5492 = shalt.err (!%p5489_p4)
}
0x10e6   : > { %4981 = dma.vmem_to_hbm [thread:$0]  (%p6604_p9), %s4254_s8, 128, %s4251_s6, %s4229_s2  }
0x10e7 PF: > { %s6609_s5 = sld [smem:[#allocation50_spill]]  ;;  %p5038_p0 = scmp.ge.s32.totalorder %s5567_s0, 2 }
0x10e8   : > { %s6610_s4 = sld [smem:[#allocation54_spill]] }
0x10ed   : > { %s4299_s15 = sand.u32 1, %s6609_s5  }
0x10ee   : > { %p6611_p8 = scmp.ne.s32.totalorder %s6610_s4, 0  ;;  %s4300_s18 = scalar_lea.sflag [#allocation8], %s4299_s15 }
0x10f0   : > { %p5013_p10 = pnand %p5038_p0, %p6611_p8 }
0x10f2   : > { %p5014_p1 = pneg %p5013_p10 }
0x10f4   : > { %5538 = dma.done.wait (%p5014_p1), %s4300_s18, 128  }
0x10f5   : > { %5540 = vsyncadd (%p5014_p1), %s4300_s18, 4294967168  ;;  %s6612_s11 = sadd.s32 4294967294, %s5567_s0  }
0x10f6   : > { %s4308_s10 = sand.u32 1, %s6612_s11  }
0x10f7   : > { %s4309_s1 = scalar_lea.sflag [#allocation22], %s4308_s10 }
0x10f8   : > { %5542 = dma.done.wait (%p5014_p1), %s4309_s1, 512  }
0x10f9   : > { %5544 = vsyncadd (%p5014_p1), %s4309_s1, 4294966784  ;;  %s83_s0 = sadd.s32 1, %s5567_s0   ;;  %s6613_s7 = sld [smem:[#allocation51_spill]] }
0x10fa   : > { %p80_p9 = scmp.ge.s32.totalorder %s83_s0, 4   ;;  %s6614_s18 = sld [smem:[#allocation55_spill]] }
0x10fb   : > { %s6615_s22 = sld [smem:[#allocation52_spill]]  ;;  %s6617_s15 = smov %s5551_s16 }
0x10fc   : > { %s6616_s23 = sld [smem:[#allocation53_spill]]  ;;  %82 = sbr.rel (!%p80_p9) target bundleno = 63 (0x3f), region = 270 }
0x10ff   : > { %s6618_s16 = smov %s6613_s7 }
0x1101   :  { %4323 = vsyncpa [#allocation7], 1 }
0x1102   :  { %4325 = vsyncpa [#allocation7 + $0x1], 1 }
0x1103   :  { %4326 = vsyncpa [#allocation10], 1 }
0x1104   :  { %4327 = vsyncpa [#allocation13], 1 }
0x1105   :  { %4328 = vsyncpa [#allocation16], 1 }
0x1106   :  { %4329 = vsyncpa [#allocation19], 1 }
0x1107   :  { %4330 = vsyncpa [#allocation8], 1 }
0x1108   :  { %4332 = vsyncpa [#allocation8 + $0x1], 1 }
0x1109   :  { %4333 = vsyncpa [#allocation22], 1 }
0x110a   :  { %4335 = vsyncpa [#allocation22 + $0x1], 1 }

</bundles_post_ra>
